<compile_context>
chip_gen: v7x
topology: tpu7x:2x2x1
jax: 0.10.0
libtpu: 0.0.40
codegen_flags: <defaults>
</compile_context>

<pallas_src>
import jax
import jax.numpy as jnp
from jax.experimental import pallas as pl
from jax.experimental.pallas import tpu as pltpu

F_IN = 4     # CartPole state features
HID = 20     # hidden units
LANES = 128  # lane width


def _cdiv(a, b):
    return -(-a // b)


def _net_kernel(xt_ref, w1_ref, b1_ref, w2d_ref, b2d_ref, out_ref):
    """One batch tile, batch folded into dense (sublane, lane) slabs.

    xt_ref  : (4,  SB, 128) VMEM  — inputs, feature-major, batch dense
    w1_ref  : (80,)         SMEM  — layer-1 weight, flattened (20, 4) row-major
    b1_ref  : (20,)         SMEM  — layer-1 bias
    w2d_ref : (20,)         SMEM  — layer-2 weight difference w2[0]-w2[1]
    b2d_ref : (1,)          SMEM  — layer-2 bias  difference b2[0]-b2[1]
    out_ref : (2,  SB, 128) VMEM  — softmax probabilities (class 0, class 1)
    """
    x0 = xt_ref[0]
    x1 = xt_ref[1]
    x2 = xt_ref[2]
    x3 = xt_ref[3]

    # Fused Linear(4,20) -> ReLU -> (w2[0]-w2[1]) dot: accumulate the logit
    # difference without ever materializing the (20, TB) hidden activation.
    ld = jnp.zeros_like(x0)
    for j in range(HID):                       # static unroll, scalar splats
        h = (w1_ref[4 * j + 0] * x0
             + w1_ref[4 * j + 1] * x1
             + w1_ref[4 * j + 2] * x2
             + w1_ref[4 * j + 3] * x3
             + b1_ref[j])
        h = jnp.maximum(h, 0.0)
        ld = ld + w2d_ref[j] * h
    ld = ld + b2d_ref[0]

    # 2-class softmax == sigmoid(logit0 - logit1); exp goes to the EUP slot.
    p0 = 1.0 / (1.0 + jnp.exp(-ld))
    out_ref[0] = p0                            # two direct dense stores,
    out_ref[1] = 1.0 - p0                      # no concat / sublane copies


def net_forward(x, w1, b1, w2, b2, *, block_rows=256):
    """Forward pass of `Net`.

    x  : (B, 4)  float32 states
    w1 : (20, 4), b1: (20,), w2: (2, 20), b2: (2,)   (PyTorch nn.Linear layout)
    returns (B, 2) softmax probabilities.
    """
    B = x.shape[0]

    # --- pick a dense (sublane, lane) batch tiling -------------------------
    n_rows = _cdiv(B, LANES)                   # batch rows of 128 lanes
    if n_rows <= 8:
        sb = n_rows                            # full dim -> always legal
    else:
        # multiple of 8, capped, and >= 2 grid steps so v7x can use both TCs
        sb = min(block_rows, (n_rows + 1) // 2)
        sb = max(8, (sb // 8) * 8)
    n_rows_pad = sb * _cdiv(n_rows, sb)
    b_pad = n_rows_pad * LANES

    # --- wrapper plumbing (single pad of x^T, skip when already aligned) ---
    xt = x.astype(jnp.float32).T               # (4, B)
    if b_pad != B:
        xt = jnp.pad(xt, ((0, 0), (0, b_pad - B)))
    xt = xt.reshape(F_IN, n_rows_pad, LANES)   # (4, ROWS, 128)

    w1_flat = w1.astype(jnp.float32).reshape(-1)                   # (80,)
    b1_flat = b1.astype(jnp.float32).reshape(-1)                   # (20,)
    w2d = (w2[0, :] - w2[1, :]).astype(jnp.float32).reshape(-1)    # (20,)
    b2d = (b2[0] - b2[1]).astype(jnp.float32).reshape(1)           # (1,)

    grid = (n_rows_pad // sb,)

    cost = pl.CostEstimate(
        flops=b_pad * (2 * F_IN * HID + 3 * HID + 6),
        transcendentals=b_pad,                 # one exp per row (sigmoid)
        bytes_accessed=b_pad * (F_IN + 2) * 4
        + 4 * (w1_flat.size + b1_flat.size + w2d.size + b2d.size),
    )

    out = pl.pallas_call(
        _net_kernel,
        out_shape=jax.ShapeDtypeStruct((2, n_rows_pad, LANES), jnp.float32),
        grid=grid,
        in_specs=[
            pl.BlockSpec((F_IN, sb, LANES), lambda i: (0, i, 0)),  # dense slabs
            pl.BlockSpec(memory_space=pltpu.MemorySpace.SMEM),     # w1 scalars
            pl.BlockSpec(memory_space=pltpu.MemorySpace.SMEM),     # b1 scalars
            pl.BlockSpec(memory_space=pltpu.MemorySpace.SMEM),     # w2 diff
            pl.BlockSpec(memory_space=pltpu.MemorySpace.SMEM),     # b2 diff
        ],
        out_specs=pl.BlockSpec((2, sb, LANES), lambda i: (0, i, 0)),
        compiler_params=pltpu.CompilerParams(
            dimension_semantics=("parallel",),  # batch axis: shardable across TCs
        ),
        cost_estimate=cost,
    )(xt, w1_flat, b1_flat, w2d, b2d)

    return out.reshape(2, b_pad)[:, :B].T      # back to (B, 2)


def init_params(key):
    """nn.Linear-style U(-1/sqrt(fan_in), 1/sqrt(fan_in)) init, PyTorch layout."""
    k1, k2, k3, k4 = jax.random.split(key, 4)
    bound1 = 1.0 / jnp.sqrt(4.0)
    bound2 = 1.0 / jnp.sqrt(20.0)
    w1 = jax.random.uniform(k1, (HID, F_IN), jnp.float32, -bound1, bound1)
    b1 = jax.random.uniform(k2, (HID,), jnp.float32, -bound1, bound1)
    w2 = jax.random.uniform(k3, (2, HID), jnp.float32, -bound2, bound2)
    b2 = jax.random.uniform(k4, (2,), jnp.float32, -bound2, bound2)
    return w1, b1, w2, b2


def net_forward_ref(x, w1, b1, w2, b2):
    """Plain-JAX reference (PyTorch semantics)."""
    h = jnp.maximum(x @ w1.T + b1, 0.0)
    logits = h @ w2.T + b2
    return jax.nn.softmax(logits, axis=1)


# TODO(synk): LossV1/Loss and Categorical action sampling are training/host-side
# code in the original module, not part of the forward pass; not ported.

if __name__ == "__main__":
    key = jax.random.PRNGKey(0)
    k_x, k_x2, k_p = jax.random.split(key, 3)
    w1, b1, w2, b2 = init_params(k_p)

    # Small batch of CartPole states (4 features each): single-block path.
    batch = 8
    x = jax.random.normal(k_x, (batch, 4), dtype=jnp.float32)
    out = jax.block_until_ready(net_forward(x, w1, b1, w2, b2))
    ref = net_forward_ref(x, w1, b1, w2, b2)
    assert out.shape == (batch, 2)
    assert jnp.allclose(out, ref, atol=1e-5, rtol=1e-5)
    assert jnp.allclose(jnp.sum(out, axis=1), jnp.ones((batch,)), atol=1e-5)

    # Larger batch: exercises padding + multi-step grid (multiple-of-8 tile).
    batch2 = 1200
    x2 = jax.random.normal(k_x2, (batch2, 4), dtype=jnp.float32)
    out2 = jax.block_until_ready(net_forward(x2, w1, b1, w2, b2))
    ref2 = net_forward_ref(x2, w1, b1, w2, b2)
    assert out2.shape == (batch2, 2)
    assert jnp.allclose(out2, ref2, atol=1e-5, rtol=1e-5)

    print("KERNEL_OK")
</pallas_src>

<mosaic_0001>
module attributes {stable_mosaic.version = 11 : i64} {
  func.func @_net_kernel(%arg0: i32, %arg1: memref<4x1x128xf32, #tpu.memory_space<vmem>>, %arg2: memref<80xf32, #tpu.memory_space<smem>>, %arg3: memref<20xf32, #tpu.memory_space<smem>>, %arg4: memref<20xf32, #tpu.memory_space<smem>>, %arg5: memref<1xf32, #tpu.memory_space<smem>>, %arg6: memref<2x1x128xf32, #tpu.memory_space<vmem>>) attributes {dimension_semantics = [#tpu.dimension_semantics<parallel>], iteration_bounds = array<i64: 1>, scalar_prefetch = 0 : i64, scratch_operands = 0 : i64, tpu.core_type = #tpu.core_type<tc>, window_params = [{transform_indices = @transform_0, window_bounds = array<i64: 4, 1, 128>}, {transform_indices = @transform_1, window_bounds = array<i64: 80>}, {transform_indices = @transform_2, window_bounds = array<i64: 20>}, {transform_indices = @transform_3, window_bounds = array<i64: 20>}, {transform_indices = @transform_4, window_bounds = array<i64: 1>}, {transform_indices = @transform_5, window_bounds = array<i64: 2, 1, 128>}]} {
    %c0 = arith.constant 0 : index
    %c0_0 = arith.constant 0 : index
    %c0_1 = arith.constant 0 : index
    %0 = vector.load %arg1[%c0, %c0_0, %c0_1] : memref<4x1x128xf32, #tpu.memory_space<vmem>>, vector<1x1x128xf32>
    %1 = vector.shape_cast %0 : vector<1x1x128xf32> to vector<1x128xf32>
    %c1 = arith.constant 1 : index
    %c0_2 = arith.constant 0 : index
    %c0_3 = arith.constant 0 : index
    %2 = vector.load %arg1[%c1, %c0_2, %c0_3] : memref<4x1x128xf32, #tpu.memory_space<vmem>>, vector<1x1x128xf32>
    %3 = vector.shape_cast %2 : vector<1x1x128xf32> to vector<1x128xf32>
    %c2 = arith.constant 2 : index
    %c0_4 = arith.constant 0 : index
    %c0_5 = arith.constant 0 : index
    %4 = vector.load %arg1[%c2, %c0_4, %c0_5] : memref<4x1x128xf32, #tpu.memory_space<vmem>>, vector<1x1x128xf32>
    %5 = vector.shape_cast %4 : vector<1x1x128xf32> to vector<1x128xf32>
    %c3 = arith.constant 3 : index
    %c0_6 = arith.constant 0 : index
    %c0_7 = arith.constant 0 : index
    %6 = vector.load %arg1[%c3, %c0_6, %c0_7] : memref<4x1x128xf32, #tpu.memory_space<vmem>>, vector<1x1x128xf32>
    %7 = vector.shape_cast %6 : vector<1x1x128xf32> to vector<1x128xf32>
    %cst = arith.constant 0.000000e+00 : f32
    %8 = vector.broadcast %cst : f32 to vector<1x128xf32>
    %c0_8 = arith.constant 0 : index
    %9 = memref.load %arg2[%c0_8] : memref<80xf32, #tpu.memory_space<smem>>
    %10 = vector.broadcast %9 : f32 to vector<1x128xf32>
    %11 = arith.mulf %10, %1 : vector<1x128xf32>
    %c1_9 = arith.constant 1 : index
    %12 = memref.load %arg2[%c1_9] : memref<80xf32, #tpu.memory_space<smem>>
    %13 = vector.broadcast %12 : f32 to vector<1x128xf32>
    %14 = arith.mulf %13, %3 : vector<1x128xf32>
    %15 = arith.addf %11, %14 : vector<1x128xf32>
    %c2_10 = arith.constant 2 : index
    %16 = memref.load %arg2[%c2_10] : memref<80xf32, #tpu.memory_space<smem>>
    %17 = vector.broadcast %16 : f32 to vector<1x128xf32>
    %18 = arith.mulf %17, %5 : vector<1x128xf32>
    %19 = arith.addf %15, %18 : vector<1x128xf32>
    %c3_11 = arith.constant 3 : index
    %20 = memref.load %arg2[%c3_11] : memref<80xf32, #tpu.memory_space<smem>>
    %21 = vector.broadcast %20 : f32 to vector<1x128xf32>
    %22 = arith.mulf %21, %7 : vector<1x128xf32>
    %23 = arith.addf %19, %22 : vector<1x128xf32>
    %c0_12 = arith.constant 0 : index
    %24 = memref.load %arg3[%c0_12] : memref<20xf32, #tpu.memory_space<smem>>
    %25 = vector.broadcast %24 : f32 to vector<1x128xf32>
    %26 = arith.addf %23, %25 : vector<1x128xf32>
    %cst_13 = arith.constant 0.000000e+00 : f32
    %27 = vector.broadcast %cst_13 : f32 to vector<1x128xf32>
    %28 = arith.maximumf %26, %27 : vector<1x128xf32>
    %c0_14 = arith.constant 0 : index
    %29 = memref.load %arg4[%c0_14] : memref<20xf32, #tpu.memory_space<smem>>
    %30 = vector.broadcast %29 : f32 to vector<1x128xf32>
    %31 = arith.mulf %30, %28 : vector<1x128xf32>
    %32 = arith.addf %8, %31 : vector<1x128xf32>
    %c4 = arith.constant 4 : index
    %33 = memref.load %arg2[%c4] : memref<80xf32, #tpu.memory_space<smem>>
    %34 = vector.broadcast %33 : f32 to vector<1x128xf32>
    %35 = arith.mulf %34, %1 : vector<1x128xf32>
    %c5 = arith.constant 5 : index
    %36 = memref.load %arg2[%c5] : memref<80xf32, #tpu.memory_space<smem>>
    %37 = vector.broadcast %36 : f32 to vector<1x128xf32>
    %38 = arith.mulf %37, %3 : vector<1x128xf32>
    %39 = arith.addf %35, %38 : vector<1x128xf32>
    %c6 = arith.constant 6 : index
    %40 = memref.load %arg2[%c6] : memref<80xf32, #tpu.memory_space<smem>>
    %41 = vector.broadcast %40 : f32 to vector<1x128xf32>
    %42 = arith.mulf %41, %5 : vector<1x128xf32>
    %43 = arith.addf %39, %42 : vector<1x128xf32>
    %c7 = arith.constant 7 : index
    %44 = memref.load %arg2[%c7] : memref<80xf32, #tpu.memory_space<smem>>
    %45 = vector.broadcast %44 : f32 to vector<1x128xf32>
    %46 = arith.mulf %45, %7 : vector<1x128xf32>
    %47 = arith.addf %43, %46 : vector<1x128xf32>
    %c1_15 = arith.constant 1 : index
    %48 = memref.load %arg3[%c1_15] : memref<20xf32, #tpu.memory_space<smem>>
    %49 = vector.broadcast %48 : f32 to vector<1x128xf32>
    %50 = arith.addf %47, %49 : vector<1x128xf32>
    %cst_16 = arith.constant 0.000000e+00 : f32
    %51 = vector.broadcast %cst_16 : f32 to vector<1x128xf32>
    %52 = arith.maximumf %50, %51 : vector<1x128xf32>
    %c1_17 = arith.constant 1 : index
    %53 = memref.load %arg4[%c1_17] : memref<20xf32, #tpu.memory_space<smem>>
    %54 = vector.broadcast %53 : f32 to vector<1x128xf32>
    %55 = arith.mulf %54, %52 : vector<1x128xf32>
    %56 = arith.addf %32, %55 : vector<1x128xf32>
    %c8 = arith.constant 8 : index
    %57 = memref.load %arg2[%c8] : memref<80xf32, #tpu.memory_space<smem>>
    %58 = vector.broadcast %57 : f32 to vector<1x128xf32>
    %59 = arith.mulf %58, %1 : vector<1x128xf32>
    %c9 = arith.constant 9 : index
    %60 = memref.load %arg2[%c9] : memref<80xf32, #tpu.memory_space<smem>>
    %61 = vector.broadcast %60 : f32 to vector<1x128xf32>
    %62 = arith.mulf %61, %3 : vector<1x128xf32>
    %63 = arith.addf %59, %62 : vector<1x128xf32>
    %c10 = arith.constant 10 : index
    %64 = memref.load %arg2[%c10] : memref<80xf32, #tpu.memory_space<smem>>
    %65 = vector.broadcast %64 : f32 to vector<1x128xf32>
    %66 = arith.mulf %65, %5 : vector<1x128xf32>
    %67 = arith.addf %63, %66 : vector<1x128xf32>
    %c11 = arith.constant 11 : index
    %68 = memref.load %arg2[%c11] : memref<80xf32, #tpu.memory_space<smem>>
    %69 = vector.broadcast %68 : f32 to vector<1x128xf32>
    %70 = arith.mulf %69, %7 : vector<1x128xf32>
    %71 = arith.addf %67, %70 : vector<1x128xf32>
    %c2_18 = arith.constant 2 : index
    %72 = memref.load %arg3[%c2_18] : memref<20xf32, #tpu.memory_space<smem>>
    %73 = vector.broadcast %72 : f32 to vector<1x128xf32>
    %74 = arith.addf %71, %73 : vector<1x128xf32>
    %cst_19 = arith.constant 0.000000e+00 : f32
    %75 = vector.broadcast %cst_19 : f32 to vector<1x128xf32>
    %76 = arith.maximumf %74, %75 : vector<1x128xf32>
    %c2_20 = arith.constant 2 : index
    %77 = memref.load %arg4[%c2_20] : memref<20xf32, #tpu.memory_space<smem>>
    %78 = vector.broadcast %77 : f32 to vector<1x128xf32>
    %79 = arith.mulf %78, %76 : vector<1x128xf32>
    %80 = arith.addf %56, %79 : vector<1x128xf32>
    %c12 = arith.constant 12 : index
    %81 = memref.load %arg2[%c12] : memref<80xf32, #tpu.memory_space<smem>>
    %82 = vector.broadcast %81 : f32 to vector<1x128xf32>
    %83 = arith.mulf %82, %1 : vector<1x128xf32>
    %c13 = arith.constant 13 : index
    %84 = memref.load %arg2[%c13] : memref<80xf32, #tpu.memory_space<smem>>
    %85 = vector.broadcast %84 : f32 to vector<1x128xf32>
    %86 = arith.mulf %85, %3 : vector<1x128xf32>
    %87 = arith.addf %83, %86 : vector<1x128xf32>
    %c14 = arith.constant 14 : index
    %88 = memref.load %arg2[%c14] : memref<80xf32, #tpu.memory_space<smem>>
    %89 = vector.broadcast %88 : f32 to vector<1x128xf32>
    %90 = arith.mulf %89, %5 : vector<1x128xf32>
    %91 = arith.addf %87, %90 : vector<1x128xf32>
    %c15 = arith.constant 15 : index
    %92 = memref.load %arg2[%c15] : memref<80xf32, #tpu.memory_space<smem>>
    %93 = vector.broadcast %92 : f32 to vector<1x128xf32>
    %94 = arith.mulf %93, %7 : vector<1x128xf32>
    %95 = arith.addf %91, %94 : vector<1x128xf32>
    %c3_21 = arith.constant 3 : index
    %96 = memref.load %arg3[%c3_21] : memref<20xf32, #tpu.memory_space<smem>>
    %97 = vector.broadcast %96 : f32 to vector<1x128xf32>
    %98 = arith.addf %95, %97 : vector<1x128xf32>
    %cst_22 = arith.constant 0.000000e+00 : f32
    %99 = vector.broadcast %cst_22 : f32 to vector<1x128xf32>
    %100 = arith.maximumf %98, %99 : vector<1x128xf32>
    %c3_23 = arith.constant 3 : index
    %101 = memref.load %arg4[%c3_23] : memref<20xf32, #tpu.memory_space<smem>>
    %102 = vector.broadcast %101 : f32 to vector<1x128xf32>
    %103 = arith.mulf %102, %100 : vector<1x128xf32>
    %104 = arith.addf %80, %103 : vector<1x128xf32>
    %c16 = arith.constant 16 : index
    %105 = memref.load %arg2[%c16] : memref<80xf32, #tpu.memory_space<smem>>
    %106 = vector.broadcast %105 : f32 to vector<1x128xf32>
    %107 = arith.mulf %106, %1 : vector<1x128xf32>
    %c17 = arith.constant 17 : index
    %108 = memref.load %arg2[%c17] : memref<80xf32, #tpu.memory_space<smem>>
    %109 = vector.broadcast %108 : f32 to vector<1x128xf32>
    %110 = arith.mulf %109, %3 : vector<1x128xf32>
    %111 = arith.addf %107, %110 : vector<1x128xf32>
    %c18 = arith.constant 18 : index
    %112 = memref.load %arg2[%c18] : memref<80xf32, #tpu.memory_space<smem>>
    %113 = vector.broadcast %112 : f32 to vector<1x128xf32>
    %114 = arith.mulf %113, %5 : vector<1x128xf32>
    %115 = arith.addf %111, %114 : vector<1x128xf32>
    %c19 = arith.constant 19 : index
    %116 = memref.load %arg2[%c19] : memref<80xf32, #tpu.memory_space<smem>>
    %117 = vector.broadcast %116 : f32 to vector<1x128xf32>
    %118 = arith.mulf %117, %7 : vector<1x128xf32>
    %119 = arith.addf %115, %118 : vector<1x128xf32>
    %c4_24 = arith.constant 4 : index
    %120 = memref.load %arg3[%c4_24] : memref<20xf32, #tpu.memory_space<smem>>
    %121 = vector.broadcast %120 : f32 to vector<1x128xf32>
    %122 = arith.addf %119, %121 : vector<1x128xf32>
    %cst_25 = arith.constant 0.000000e+00 : f32
    %123 = vector.broadcast %cst_25 : f32 to vector<1x128xf32>
    %124 = arith.maximumf %122, %123 : vector<1x128xf32>
    %c4_26 = arith.constant 4 : index
    %125 = memref.load %arg4[%c4_26] : memref<20xf32, #tpu.memory_space<smem>>
    %126 = vector.broadcast %125 : f32 to vector<1x128xf32>
    %127 = arith.mulf %126, %124 : vector<1x128xf32>
    %128 = arith.addf %104, %127 : vector<1x128xf32>
    %c20 = arith.constant 20 : index
    %129 = memref.load %arg2[%c20] : memref<80xf32, #tpu.memory_space<smem>>
    %130 = vector.broadcast %129 : f32 to vector<1x128xf32>
    %131 = arith.mulf %130, %1 : vector<1x128xf32>
    %c21 = arith.constant 21 : index
    %132 = memref.load %arg2[%c21] : memref<80xf32, #tpu.memory_space<smem>>
    %133 = vector.broadcast %132 : f32 to vector<1x128xf32>
    %134 = arith.mulf %133, %3 : vector<1x128xf32>
    %135 = arith.addf %131, %134 : vector<1x128xf32>
    %c22 = arith.constant 22 : index
    %136 = memref.load %arg2[%c22] : memref<80xf32, #tpu.memory_space<smem>>
    %137 = vector.broadcast %136 : f32 to vector<1x128xf32>
    %138 = arith.mulf %137, %5 : vector<1x128xf32>
    %139 = arith.addf %135, %138 : vector<1x128xf32>
    %c23 = arith.constant 23 : index
    %140 = memref.load %arg2[%c23] : memref<80xf32, #tpu.memory_space<smem>>
    %141 = vector.broadcast %140 : f32 to vector<1x128xf32>
    %142 = arith.mulf %141, %7 : vector<1x128xf32>
    %143 = arith.addf %139, %142 : vector<1x128xf32>
    %c5_27 = arith.constant 5 : index
    %144 = memref.load %arg3[%c5_27] : memref<20xf32, #tpu.memory_space<smem>>
    %145 = vector.broadcast %144 : f32 to vector<1x128xf32>
    %146 = arith.addf %143, %145 : vector<1x128xf32>
    %cst_28 = arith.constant 0.000000e+00 : f32
    %147 = vector.broadcast %cst_28 : f32 to vector<1x128xf32>
    %148 = arith.maximumf %146, %147 : vector<1x128xf32>
    %c5_29 = arith.constant 5 : index
    %149 = memref.load %arg4[%c5_29] : memref<20xf32, #tpu.memory_space<smem>>
    %150 = vector.broadcast %149 : f32 to vector<1x128xf32>
    %151 = arith.mulf %150, %148 : vector<1x128xf32>
    %152 = arith.addf %128, %151 : vector<1x128xf32>
    %c24 = arith.constant 24 : index
    %153 = memref.load %arg2[%c24] : memref<80xf32, #tpu.memory_space<smem>>
    %154 = vector.broadcast %153 : f32 to vector<1x128xf32>
    %155 = arith.mulf %154, %1 : vector<1x128xf32>
    %c25 = arith.constant 25 : index
    %156 = memref.load %arg2[%c25] : memref<80xf32, #tpu.memory_space<smem>>
    %157 = vector.broadcast %156 : f32 to vector<1x128xf32>
    %158 = arith.mulf %157, %3 : vector<1x128xf32>
    %159 = arith.addf %155, %158 : vector<1x128xf32>
    %c26 = arith.constant 26 : index
    %160 = memref.load %arg2[%c26] : memref<80xf32, #tpu.memory_space<smem>>
    %161 = vector.broadcast %160 : f32 to vector<1x128xf32>
    %162 = arith.mulf %161, %5 : vector<1x128xf32>
    %163 = arith.addf %159, %162 : vector<1x128xf32>
    %c27 = arith.constant 27 : index
    %164 = memref.load %arg2[%c27] : memref<80xf32, #tpu.memory_space<smem>>
    %165 = vector.broadcast %164 : f32 to vector<1x128xf32>
    %166 = arith.mulf %165, %7 : vector<1x128xf32>
    %167 = arith.addf %163, %166 : vector<1x128xf32>
    %c6_30 = arith.constant 6 : index
    %168 = memref.load %arg3[%c6_30] : memref<20xf32, #tpu.memory_space<smem>>
    %169 = vector.broadcast %168 : f32 to vector<1x128xf32>
    %170 = arith.addf %167, %169 : vector<1x128xf32>
    %cst_31 = arith.constant 0.000000e+00 : f32
    %171 = vector.broadcast %cst_31 : f32 to vector<1x128xf32>
    %172 = arith.maximumf %170, %171 : vector<1x128xf32>
    %c6_32 = arith.constant 6 : index
    %173 = memref.load %arg4[%c6_32] : memref<20xf32, #tpu.memory_space<smem>>
    %174 = vector.broadcast %173 : f32 to vector<1x128xf32>
    %175 = arith.mulf %174, %172 : vector<1x128xf32>
    %176 = arith.addf %152, %175 : vector<1x128xf32>
    %c28 = arith.constant 28 : index
    %177 = memref.load %arg2[%c28] : memref<80xf32, #tpu.memory_space<smem>>
    %178 = vector.broadcast %177 : f32 to vector<1x128xf32>
    %179 = arith.mulf %178, %1 : vector<1x128xf32>
    %c29 = arith.constant 29 : index
    %180 = memref.load %arg2[%c29] : memref<80xf32, #tpu.memory_space<smem>>
    %181 = vector.broadcast %180 : f32 to vector<1x128xf32>
    %182 = arith.mulf %181, %3 : vector<1x128xf32>
    %183 = arith.addf %179, %182 : vector<1x128xf32>
    %c30 = arith.constant 30 : index
    %184 = memref.load %arg2[%c30] : memref<80xf32, #tpu.memory_space<smem>>
    %185 = vector.broadcast %184 : f32 to vector<1x128xf32>
    %186 = arith.mulf %185, %5 : vector<1x128xf32>
    %187 = arith.addf %183, %186 : vector<1x128xf32>
    %c31 = arith.constant 31 : index
    %188 = memref.load %arg2[%c31] : memref<80xf32, #tpu.memory_space<smem>>
    %189 = vector.broadcast %188 : f32 to vector<1x128xf32>
    %190 = arith.mulf %189, %7 : vector<1x128xf32>
    %191 = arith.addf %187, %190 : vector<1x128xf32>
    %c7_33 = arith.constant 7 : index
    %192 = memref.load %arg3[%c7_33] : memref<20xf32, #tpu.memory_space<smem>>
    %193 = vector.broadcast %192 : f32 to vector<1x128xf32>
    %194 = arith.addf %191, %193 : vector<1x128xf32>
    %cst_34 = arith.constant 0.000000e+00 : f32
    %195 = vector.broadcast %cst_34 : f32 to vector<1x128xf32>
    %196 = arith.maximumf %194, %195 : vector<1x128xf32>
    %c7_35 = arith.constant 7 : index
    %197 = memref.load %arg4[%c7_35] : memref<20xf32, #tpu.memory_space<smem>>
    %198 = vector.broadcast %197 : f32 to vector<1x128xf32>
    %199 = arith.mulf %198, %196 : vector<1x128xf32>
    %200 = arith.addf %176, %199 : vector<1x128xf32>
    %c32 = arith.constant 32 : index
    %201 = memref.load %arg2[%c32] : memref<80xf32, #tpu.memory_space<smem>>
    %202 = vector.broadcast %201 : f32 to vector<1x128xf32>
    %203 = arith.mulf %202, %1 : vector<1x128xf32>
    %c33 = arith.constant 33 : index
    %204 = memref.load %arg2[%c33] : memref<80xf32, #tpu.memory_space<smem>>
    %205 = vector.broadcast %204 : f32 to vector<1x128xf32>
    %206 = arith.mulf %205, %3 : vector<1x128xf32>
    %207 = arith.addf %203, %206 : vector<1x128xf32>
    %c34 = arith.constant 34 : index
    %208 = memref.load %arg2[%c34] : memref<80xf32, #tpu.memory_space<smem>>
    %209 = vector.broadcast %208 : f32 to vector<1x128xf32>
    %210 = arith.mulf %209, %5 : vector<1x128xf32>
    %211 = arith.addf %207, %210 : vector<1x128xf32>
    %c35 = arith.constant 35 : index
    %212 = memref.load %arg2[%c35] : memref<80xf32, #tpu.memory_space<smem>>
    %213 = vector.broadcast %212 : f32 to vector<1x128xf32>
    %214 = arith.mulf %213, %7 : vector<1x128xf32>
    %215 = arith.addf %211, %214 : vector<1x128xf32>
    %c8_36 = arith.constant 8 : index
    %216 = memref.load %arg3[%c8_36] : memref<20xf32, #tpu.memory_space<smem>>
    %217 = vector.broadcast %216 : f32 to vector<1x128xf32>
    %218 = arith.addf %215, %217 : vector<1x128xf32>
    %cst_37 = arith.constant 0.000000e+00 : f32
    %219 = vector.broadcast %cst_37 : f32 to vector<1x128xf32>
    %220 = arith.maximumf %218, %219 : vector<1x128xf32>
    %c8_38 = arith.constant 8 : index
    %221 = memref.load %arg4[%c8_38] : memref<20xf32, #tpu.memory_space<smem>>
    %222 = vector.broadcast %221 : f32 to vector<1x128xf32>
    %223 = arith.mulf %222, %220 : vector<1x128xf32>
    %224 = arith.addf %200, %223 : vector<1x128xf32>
    %c36 = arith.constant 36 : index
    %225 = memref.load %arg2[%c36] : memref<80xf32, #tpu.memory_space<smem>>
    %226 = vector.broadcast %225 : f32 to vector<1x128xf32>
    %227 = arith.mulf %226, %1 : vector<1x128xf32>
    %c37 = arith.constant 37 : index
    %228 = memref.load %arg2[%c37] : memref<80xf32, #tpu.memory_space<smem>>
    %229 = vector.broadcast %228 : f32 to vector<1x128xf32>
    %230 = arith.mulf %229, %3 : vector<1x128xf32>
    %231 = arith.addf %227, %230 : vector<1x128xf32>
    %c38 = arith.constant 38 : index
    %232 = memref.load %arg2[%c38] : memref<80xf32, #tpu.memory_space<smem>>
    %233 = vector.broadcast %232 : f32 to vector<1x128xf32>
    %234 = arith.mulf %233, %5 : vector<1x128xf32>
    %235 = arith.addf %231, %234 : vector<1x128xf32>
    %c39 = arith.constant 39 : index
    %236 = memref.load %arg2[%c39] : memref<80xf32, #tpu.memory_space<smem>>
    %237 = vector.broadcast %236 : f32 to vector<1x128xf32>
    %238 = arith.mulf %237, %7 : vector<1x128xf32>
    %239 = arith.addf %235, %238 : vector<1x128xf32>
    %c9_39 = arith.constant 9 : index
    %240 = memref.load %arg3[%c9_39] : memref<20xf32, #tpu.memory_space<smem>>
    %241 = vector.broadcast %240 : f32 to vector<1x128xf32>
    %242 = arith.addf %239, %241 : vector<1x128xf32>
    %cst_40 = arith.constant 0.000000e+00 : f32
    %243 = vector.broadcast %cst_40 : f32 to vector<1x128xf32>
    %244 = arith.maximumf %242, %243 : vector<1x128xf32>
    %c9_41 = arith.constant 9 : index
    %245 = memref.load %arg4[%c9_41] : memref<20xf32, #tpu.memory_space<smem>>
    %246 = vector.broadcast %245 : f32 to vector<1x128xf32>
    %247 = arith.mulf %246, %244 : vector<1x128xf32>
    %248 = arith.addf %224, %247 : vector<1x128xf32>
    %c40 = arith.constant 40 : index
    %249 = memref.load %arg2[%c40] : memref<80xf32, #tpu.memory_space<smem>>
    %250 = vector.broadcast %249 : f32 to vector<1x128xf32>
    %251 = arith.mulf %250, %1 : vector<1x128xf32>
    %c41 = arith.constant 41 : index
    %252 = memref.load %arg2[%c41] : memref<80xf32, #tpu.memory_space<smem>>
    %253 = vector.broadcast %252 : f32 to vector<1x128xf32>
    %254 = arith.mulf %253, %3 : vector<1x128xf32>
    %255 = arith.addf %251, %254 : vector<1x128xf32>
    %c42 = arith.constant 42 : index
    %256 = memref.load %arg2[%c42] : memref<80xf32, #tpu.memory_space<smem>>
    %257 = vector.broadcast %256 : f32 to vector<1x128xf32>
    %258 = arith.mulf %257, %5 : vector<1x128xf32>
    %259 = arith.addf %255, %258 : vector<1x128xf32>
    %c43 = arith.constant 43 : index
    %260 = memref.load %arg2[%c43] : memref<80xf32, #tpu.memory_space<smem>>
    %261 = vector.broadcast %260 : f32 to vector<1x128xf32>
    %262 = arith.mulf %261, %7 : vector<1x128xf32>
    %263 = arith.addf %259, %262 : vector<1x128xf32>
    %c10_42 = arith.constant 10 : index
    %264 = memref.load %arg3[%c10_42] : memref<20xf32, #tpu.memory_space<smem>>
    %265 = vector.broadcast %264 : f32 to vector<1x128xf32>
    %266 = arith.addf %263, %265 : vector<1x128xf32>
    %cst_43 = arith.constant 0.000000e+00 : f32
    %267 = vector.broadcast %cst_43 : f32 to vector<1x128xf32>
    %268 = arith.maximumf %266, %267 : vector<1x128xf32>
    %c10_44 = arith.constant 10 : index
    %269 = memref.load %arg4[%c10_44] : memref<20xf32, #tpu.memory_space<smem>>
    %270 = vector.broadcast %269 : f32 to vector<1x128xf32>
    %271 = arith.mulf %270, %268 : vector<1x128xf32>
    %272 = arith.addf %248, %271 : vector<1x128xf32>
    %c44 = arith.constant 44 : index
    %273 = memref.load %arg2[%c44] : memref<80xf32, #tpu.memory_space<smem>>
    %274 = vector.broadcast %273 : f32 to vector<1x128xf32>
    %275 = arith.mulf %274, %1 : vector<1x128xf32>
    %c45 = arith.constant 45 : index
    %276 = memref.load %arg2[%c45] : memref<80xf32, #tpu.memory_space<smem>>
    %277 = vector.broadcast %276 : f32 to vector<1x128xf32>
    %278 = arith.mulf %277, %3 : vector<1x128xf32>
    %279 = arith.addf %275, %278 : vector<1x128xf32>
    %c46 = arith.constant 46 : index
    %280 = memref.load %arg2[%c46] : memref<80xf32, #tpu.memory_space<smem>>
    %281 = vector.broadcast %280 : f32 to vector<1x128xf32>
    %282 = arith.mulf %281, %5 : vector<1x128xf32>
    %283 = arith.addf %279, %282 : vector<1x128xf32>
    %c47 = arith.constant 47 : index
    %284 = memref.load %arg2[%c47] : memref<80xf32, #tpu.memory_space<smem>>
    %285 = vector.broadcast %284 : f32 to vector<1x128xf32>
    %286 = arith.mulf %285, %7 : vector<1x128xf32>
    %287 = arith.addf %283, %286 : vector<1x128xf32>
    %c11_45 = arith.constant 11 : index
    %288 = memref.load %arg3[%c11_45] : memref<20xf32, #tpu.memory_space<smem>>
    %289 = vector.broadcast %288 : f32 to vector<1x128xf32>
    %290 = arith.addf %287, %289 : vector<1x128xf32>
    %cst_46 = arith.constant 0.000000e+00 : f32
    %291 = vector.broadcast %cst_46 : f32 to vector<1x128xf32>
    %292 = arith.maximumf %290, %291 : vector<1x128xf32>
    %c11_47 = arith.constant 11 : index
    %293 = memref.load %arg4[%c11_47] : memref<20xf32, #tpu.memory_space<smem>>
    %294 = vector.broadcast %293 : f32 to vector<1x128xf32>
    %295 = arith.mulf %294, %292 : vector<1x128xf32>
    %296 = arith.addf %272, %295 : vector<1x128xf32>
    %c48 = arith.constant 48 : index
    %297 = memref.load %arg2[%c48] : memref<80xf32, #tpu.memory_space<smem>>
    %298 = vector.broadcast %297 : f32 to vector<1x128xf32>
    %299 = arith.mulf %298, %1 : vector<1x128xf32>
    %c49 = arith.constant 49 : index
    %300 = memref.load %arg2[%c49] : memref<80xf32, #tpu.memory_space<smem>>
    %301 = vector.broadcast %300 : f32 to vector<1x128xf32>
    %302 = arith.mulf %301, %3 : vector<1x128xf32>
    %303 = arith.addf %299, %302 : vector<1x128xf32>
    %c50 = arith.constant 50 : index
    %304 = memref.load %arg2[%c50] : memref<80xf32, #tpu.memory_space<smem>>
    %305 = vector.broadcast %304 : f32 to vector<1x128xf32>
    %306 = arith.mulf %305, %5 : vector<1x128xf32>
    %307 = arith.addf %303, %306 : vector<1x128xf32>
    %c51 = arith.constant 51 : index
    %308 = memref.load %arg2[%c51] : memref<80xf32, #tpu.memory_space<smem>>
    %309 = vector.broadcast %308 : f32 to vector<1x128xf32>
    %310 = arith.mulf %309, %7 : vector<1x128xf32>
    %311 = arith.addf %307, %310 : vector<1x128xf32>
    %c12_48 = arith.constant 12 : index
    %312 = memref.load %arg3[%c12_48] : memref<20xf32, #tpu.memory_space<smem>>
    %313 = vector.broadcast %312 : f32 to vector<1x128xf32>
    %314 = arith.addf %311, %313 : vector<1x128xf32>
    %cst_49 = arith.constant 0.000000e+00 : f32
    %315 = vector.broadcast %cst_49 : f32 to vector<1x128xf32>
    %316 = arith.maximumf %314, %315 : vector<1x128xf32>
    %c12_50 = arith.constant 12 : index
    %317 = memref.load %arg4[%c12_50] : memref<20xf32, #tpu.memory_space<smem>>
    %318 = vector.broadcast %317 : f32 to vector<1x128xf32>
    %319 = arith.mulf %318, %316 : vector<1x128xf32>
    %320 = arith.addf %296, %319 : vector<1x128xf32>
    %c52 = arith.constant 52 : index
    %321 = memref.load %arg2[%c52] : memref<80xf32, #tpu.memory_space<smem>>
    %322 = vector.broadcast %321 : f32 to vector<1x128xf32>
    %323 = arith.mulf %322, %1 : vector<1x128xf32>
    %c53 = arith.constant 53 : index
    %324 = memref.load %arg2[%c53] : memref<80xf32, #tpu.memory_space<smem>>
    %325 = vector.broadcast %324 : f32 to vector<1x128xf32>
    %326 = arith.mulf %325, %3 : vector<1x128xf32>
    %327 = arith.addf %323, %326 : vector<1x128xf32>
    %c54 = arith.constant 54 : index
    %328 = memref.load %arg2[%c54] : memref<80xf32, #tpu.memory_space<smem>>
    %329 = vector.broadcast %328 : f32 to vector<1x128xf32>
    %330 = arith.mulf %329, %5 : vector<1x128xf32>
    %331 = arith.addf %327, %330 : vector<1x128xf32>
    %c55 = arith.constant 55 : index
    %332 = memref.load %arg2[%c55] : memref<80xf32, #tpu.memory_space<smem>>
    %333 = vector.broadcast %332 : f32 to vector<1x128xf32>
    %334 = arith.mulf %333, %7 : vector<1x128xf32>
    %335 = arith.addf %331, %334 : vector<1x128xf32>
    %c13_51 = arith.constant 13 : index
    %336 = memref.load %arg3[%c13_51] : memref<20xf32, #tpu.memory_space<smem>>
    %337 = vector.broadcast %336 : f32 to vector<1x128xf32>
    %338 = arith.addf %335, %337 : vector<1x128xf32>
    %cst_52 = arith.constant 0.000000e+00 : f32
    %339 = vector.broadcast %cst_52 : f32 to vector<1x128xf32>
    %340 = arith.maximumf %338, %339 : vector<1x128xf32>
    %c13_53 = arith.constant 13 : index
    %341 = memref.load %arg4[%c13_53] : memref<20xf32, #tpu.memory_space<smem>>
    %342 = vector.broadcast %341 : f32 to vector<1x128xf32>
    %343 = arith.mulf %342, %340 : vector<1x128xf32>
    %344 = arith.addf %320, %343 : vector<1x128xf32>
    %c56 = arith.constant 56 : index
    %345 = memref.load %arg2[%c56] : memref<80xf32, #tpu.memory_space<smem>>
    %346 = vector.broadcast %345 : f32 to vector<1x128xf32>
    %347 = arith.mulf %346, %1 : vector<1x128xf32>
    %c57 = arith.constant 57 : index
    %348 = memref.load %arg2[%c57] : memref<80xf32, #tpu.memory_space<smem>>
    %349 = vector.broadcast %348 : f32 to vector<1x128xf32>
    %350 = arith.mulf %349, %3 : vector<1x128xf32>
    %351 = arith.addf %347, %350 : vector<1x128xf32>
    %c58 = arith.constant 58 : index
    %352 = memref.load %arg2[%c58] : memref<80xf32, #tpu.memory_space<smem>>
    %353 = vector.broadcast %352 : f32 to vector<1x128xf32>
    %354 = arith.mulf %353, %5 : vector<1x128xf32>
    %355 = arith.addf %351, %354 : vector<1x128xf32>
    %c59 = arith.constant 59 : index
    %356 = memref.load %arg2[%c59] : memref<80xf32, #tpu.memory_space<smem>>
    %357 = vector.broadcast %356 : f32 to vector<1x128xf32>
    %358 = arith.mulf %357, %7 : vector<1x128xf32>
    %359 = arith.addf %355, %358 : vector<1x128xf32>
    %c14_54 = arith.constant 14 : index
    %360 = memref.load %arg3[%c14_54] : memref<20xf32, #tpu.memory_space<smem>>
    %361 = vector.broadcast %360 : f32 to vector<1x128xf32>
    %362 = arith.addf %359, %361 : vector<1x128xf32>
    %cst_55 = arith.constant 0.000000e+00 : f32
    %363 = vector.broadcast %cst_55 : f32 to vector<1x128xf32>
    %364 = arith.maximumf %362, %363 : vector<1x128xf32>
    %c14_56 = arith.constant 14 : index
    %365 = memref.load %arg4[%c14_56] : memref<20xf32, #tpu.memory_space<smem>>
    %366 = vector.broadcast %365 : f32 to vector<1x128xf32>
    %367 = arith.mulf %366, %364 : vector<1x128xf32>
    %368 = arith.addf %344, %367 : vector<1x128xf32>
    %c60 = arith.constant 60 : index
    %369 = memref.load %arg2[%c60] : memref<80xf32, #tpu.memory_space<smem>>
    %370 = vector.broadcast %369 : f32 to vector<1x128xf32>
    %371 = arith.mulf %370, %1 : vector<1x128xf32>
    %c61 = arith.constant 61 : index
    %372 = memref.load %arg2[%c61] : memref<80xf32, #tpu.memory_space<smem>>
    %373 = vector.broadcast %372 : f32 to vector<1x128xf32>
    %374 = arith.mulf %373, %3 : vector<1x128xf32>
    %375 = arith.addf %371, %374 : vector<1x128xf32>
    %c62 = arith.constant 62 : index
    %376 = memref.load %arg2[%c62] : memref<80xf32, #tpu.memory_space<smem>>
    %377 = vector.broadcast %376 : f32 to vector<1x128xf32>
    %378 = arith.mulf %377, %5 : vector<1x128xf32>
    %379 = arith.addf %375, %378 : vector<1x128xf32>
    %c63 = arith.constant 63 : index
    %380 = memref.load %arg2[%c63] : memref<80xf32, #tpu.memory_space<smem>>
    %381 = vector.broadcast %380 : f32 to vector<1x128xf32>
    %382 = arith.mulf %381, %7 : vector<1x128xf32>
    %383 = arith.addf %379, %382 : vector<1x128xf32>
    %c15_57 = arith.constant 15 : index
    %384 = memref.load %arg3[%c15_57] : memref<20xf32, #tpu.memory_space<smem>>
    %385 = vector.broadcast %384 : f32 to vector<1x128xf32>
    %386 = arith.addf %383, %385 : vector<1x128xf32>
    %cst_58 = arith.constant 0.000000e+00 : f32
    %387 = vector.broadcast %cst_58 : f32 to vector<1x128xf32>
    %388 = arith.maximumf %386, %387 : vector<1x128xf32>
    %c15_59 = arith.constant 15 : index
    %389 = memref.load %arg4[%c15_59] : memref<20xf32, #tpu.memory_space<smem>>
    %390 = vector.broadcast %389 : f32 to vector<1x128xf32>
    %391 = arith.mulf %390, %388 : vector<1x128xf32>
    %392 = arith.addf %368, %391 : vector<1x128xf32>
    %c64 = arith.constant 64 : index
    %393 = memref.load %arg2[%c64] : memref<80xf32, #tpu.memory_space<smem>>
    %394 = vector.broadcast %393 : f32 to vector<1x128xf32>
    %395 = arith.mulf %394, %1 : vector<1x128xf32>
    %c65 = arith.constant 65 : index
    %396 = memref.load %arg2[%c65] : memref<80xf32, #tpu.memory_space<smem>>
    %397 = vector.broadcast %396 : f32 to vector<1x128xf32>
    %398 = arith.mulf %397, %3 : vector<1x128xf32>
    %399 = arith.addf %395, %398 : vector<1x128xf32>
    %c66 = arith.constant 66 : index
    %400 = memref.load %arg2[%c66] : memref<80xf32, #tpu.memory_space<smem>>
    %401 = vector.broadcast %400 : f32 to vector<1x128xf32>
    %402 = arith.mulf %401, %5 : vector<1x128xf32>
    %403 = arith.addf %399, %402 : vector<1x128xf32>
    %c67 = arith.constant 67 : index
    %404 = memref.load %arg2[%c67] : memref<80xf32, #tpu.memory_space<smem>>
    %405 = vector.broadcast %404 : f32 to vector<1x128xf32>
    %406 = arith.mulf %405, %7 : vector<1x128xf32>
    %407 = arith.addf %403, %406 : vector<1x128xf32>
    %c16_60 = arith.constant 16 : index
    %408 = memref.load %arg3[%c16_60] : memref<20xf32, #tpu.memory_space<smem>>
    %409 = vector.broadcast %408 : f32 to vector<1x128xf32>
    %410 = arith.addf %407, %409 : vector<1x128xf32>
    %cst_61 = arith.constant 0.000000e+00 : f32
    %411 = vector.broadcast %cst_61 : f32 to vector<1x128xf32>
    %412 = arith.maximumf %410, %411 : vector<1x128xf32>
    %c16_62 = arith.constant 16 : index
    %413 = memref.load %arg4[%c16_62] : memref<20xf32, #tpu.memory_space<smem>>
    %414 = vector.broadcast %413 : f32 to vector<1x128xf32>
    %415 = arith.mulf %414, %412 : vector<1x128xf32>
    %416 = arith.addf %392, %415 : vector<1x128xf32>
    %c68 = arith.constant 68 : index
    %417 = memref.load %arg2[%c68] : memref<80xf32, #tpu.memory_space<smem>>
    %418 = vector.broadcast %417 : f32 to vector<1x128xf32>
    %419 = arith.mulf %418, %1 : vector<1x128xf32>
    %c69 = arith.constant 69 : index
    %420 = memref.load %arg2[%c69] : memref<80xf32, #tpu.memory_space<smem>>
    %421 = vector.broadcast %420 : f32 to vector<1x128xf32>
    %422 = arith.mulf %421, %3 : vector<1x128xf32>
    %423 = arith.addf %419, %422 : vector<1x128xf32>
    %c70 = arith.constant 70 : index
    %424 = memref.load %arg2[%c70] : memref<80xf32, #tpu.memory_space<smem>>
    %425 = vector.broadcast %424 : f32 to vector<1x128xf32>
    %426 = arith.mulf %425, %5 : vector<1x128xf32>
    %427 = arith.addf %423, %426 : vector<1x128xf32>
    %c71 = arith.constant 71 : index
    %428 = memref.load %arg2[%c71] : memref<80xf32, #tpu.memory_space<smem>>
    %429 = vector.broadcast %428 : f32 to vector<1x128xf32>
    %430 = arith.mulf %429, %7 : vector<1x128xf32>
    %431 = arith.addf %427, %430 : vector<1x128xf32>
    %c17_63 = arith.constant 17 : index
    %432 = memref.load %arg3[%c17_63] : memref<20xf32, #tpu.memory_space<smem>>
    %433 = vector.broadcast %432 : f32 to vector<1x128xf32>
    %434 = arith.addf %431, %433 : vector<1x128xf32>
    %cst_64 = arith.constant 0.000000e+00 : f32
    %435 = vector.broadcast %cst_64 : f32 to vector<1x128xf32>
    %436 = arith.maximumf %434, %435 : vector<1x128xf32>
    %c17_65 = arith.constant 17 : index
    %437 = memref.load %arg4[%c17_65] : memref<20xf32, #tpu.memory_space<smem>>
    %438 = vector.broadcast %437 : f32 to vector<1x128xf32>
    %439 = arith.mulf %438, %436 : vector<1x128xf32>
    %440 = arith.addf %416, %439 : vector<1x128xf32>
    %c72 = arith.constant 72 : index
    %441 = memref.load %arg2[%c72] : memref<80xf32, #tpu.memory_space<smem>>
    %442 = vector.broadcast %441 : f32 to vector<1x128xf32>
    %443 = arith.mulf %442, %1 : vector<1x128xf32>
    %c73 = arith.constant 73 : index
    %444 = memref.load %arg2[%c73] : memref<80xf32, #tpu.memory_space<smem>>
    %445 = vector.broadcast %444 : f32 to vector<1x128xf32>
    %446 = arith.mulf %445, %3 : vector<1x128xf32>
    %447 = arith.addf %443, %446 : vector<1x128xf32>
    %c74 = arith.constant 74 : index
    %448 = memref.load %arg2[%c74] : memref<80xf32, #tpu.memory_space<smem>>
    %449 = vector.broadcast %448 : f32 to vector<1x128xf32>
    %450 = arith.mulf %449, %5 : vector<1x128xf32>
    %451 = arith.addf %447, %450 : vector<1x128xf32>
    %c75 = arith.constant 75 : index
    %452 = memref.load %arg2[%c75] : memref<80xf32, #tpu.memory_space<smem>>
    %453 = vector.broadcast %452 : f32 to vector<1x128xf32>
    %454 = arith.mulf %453, %7 : vector<1x128xf32>
    %455 = arith.addf %451, %454 : vector<1x128xf32>
    %c18_66 = arith.constant 18 : index
    %456 = memref.load %arg3[%c18_66] : memref<20xf32, #tpu.memory_space<smem>>
    %457 = vector.broadcast %456 : f32 to vector<1x128xf32>
    %458 = arith.addf %455, %457 : vector<1x128xf32>
    %cst_67 = arith.constant 0.000000e+00 : f32
    %459 = vector.broadcast %cst_67 : f32 to vector<1x128xf32>
    %460 = arith.maximumf %458, %459 : vector<1x128xf32>
    %c18_68 = arith.constant 18 : index
    %461 = memref.load %arg4[%c18_68] : memref<20xf32, #tpu.memory_space<smem>>
    %462 = vector.broadcast %461 : f32 to vector<1x128xf32>
    %463 = arith.mulf %462, %460 : vector<1x128xf32>
    %464 = arith.addf %440, %463 : vector<1x128xf32>
    %c76 = arith.constant 76 : index
    %465 = memref.load %arg2[%c76] : memref<80xf32, #tpu.memory_space<smem>>
    %466 = vector.broadcast %465 : f32 to vector<1x128xf32>
    %467 = arith.mulf %466, %1 : vector<1x128xf32>
    %c77 = arith.constant 77 : index
    %468 = memref.load %arg2[%c77] : memref<80xf32, #tpu.memory_space<smem>>
    %469 = vector.broadcast %468 : f32 to vector<1x128xf32>
    %470 = arith.mulf %469, %3 : vector<1x128xf32>
    %471 = arith.addf %467, %470 : vector<1x128xf32>
    %c78 = arith.constant 78 : index
    %472 = memref.load %arg2[%c78] : memref<80xf32, #tpu.memory_space<smem>>
    %473 = vector.broadcast %472 : f32 to vector<1x128xf32>
    %474 = arith.mulf %473, %5 : vector<1x128xf32>
    %475 = arith.addf %471, %474 : vector<1x128xf32>
    %c79 = arith.constant 79 : index
    %476 = memref.load %arg2[%c79] : memref<80xf32, #tpu.memory_space<smem>>
    %477 = vector.broadcast %476 : f32 to vector<1x128xf32>
    %478 = arith.mulf %477, %7 : vector<1x128xf32>
    %479 = arith.addf %475, %478 : vector<1x128xf32>
    %c19_69 = arith.constant 19 : index
    %480 = memref.load %arg3[%c19_69] : memref<20xf32, #tpu.memory_space<smem>>
    %481 = vector.broadcast %480 : f32 to vector<1x128xf32>
    %482 = arith.addf %479, %481 : vector<1x128xf32>
    %cst_70 = arith.constant 0.000000e+00 : f32
    %483 = vector.broadcast %cst_70 : f32 to vector<1x128xf32>
    %484 = arith.maximumf %482, %483 : vector<1x128xf32>
    %c19_71 = arith.constant 19 : index
    %485 = memref.load %arg4[%c19_71] : memref<20xf32, #tpu.memory_space<smem>>
    %486 = vector.broadcast %485 : f32 to vector<1x128xf32>
    %487 = arith.mulf %486, %484 : vector<1x128xf32>
    %488 = arith.addf %464, %487 : vector<1x128xf32>
    %c0_72 = arith.constant 0 : index
    %489 = memref.load %arg5[%c0_72] : memref<1xf32, #tpu.memory_space<smem>>
    %490 = vector.broadcast %489 : f32 to vector<1x128xf32>
    %491 = arith.addf %488, %490 : vector<1x128xf32>
    %cst_73 = arith.constant 0.000000e+00 : f32
    %492 = vector.broadcast %cst_73 : f32 to vector<1x128xf32>
    %493 = arith.subf %492, %491 : vector<1x128xf32>
    %494 = math.exp %493 : vector<1x128xf32>
    %cst_74 = arith.constant 1.000000e+00 : f32
    %495 = vector.broadcast %cst_74 : f32 to vector<1x128xf32>
    %496 = arith.addf %495, %494 : vector<1x128xf32>
    %cst_75 = arith.constant 1.000000e+00 : f32
    %497 = vector.broadcast %cst_75 : f32 to vector<1x128xf32>
    %498 = arith.divf %497, %496 : vector<1x128xf32>
    %c0_76 = arith.constant 0 : index
    %c0_77 = arith.constant 0 : index
    %c0_78 = arith.constant 0 : index
    %499 = vector.load %arg6[%c0_76, %c0_77, %c0_78] : memref<2x1x128xf32, #tpu.memory_space<vmem>>, vector<1x1x128xf32>
    %500 = vector.shape_cast %499 : vector<1x1x128xf32> to vector<1x128xf32>
    %501 = vector.shape_cast %498 : vector<1x128xf32> to vector<1x1x128xf32>
    tpu.vector_store %arg6[%c0_76, %c0_77, %c0_78], %501 {strides = array<i32>} : memref<2x1x128xf32, #tpu.memory_space<vmem>>, vector<1x1x128xf32>,
    %cst_79 = arith.constant 1.000000e+00 : f32
    %502 = vector.broadcast %cst_79 : f32 to vector<1x128xf32>
    %503 = arith.subf %502, %498 : vector<1x128xf32>
    %c1_80 = arith.constant 1 : index
    %c0_81 = arith.constant 0 : index
    %c0_82 = arith.constant 0 : index
    %504 = vector.load %arg6[%c1_80, %c0_81, %c0_82] : memref<2x1x128xf32, #tpu.memory_space<vmem>>, vector<1x1x128xf32>
    %505 = vector.shape_cast %504 : vector<1x1x128xf32> to vector<1x128xf32>
    %506 = vector.shape_cast %503 : vector<1x128xf32> to vector<1x1x128xf32>
    tpu.vector_store %arg6[%c1_80, %c0_81, %c0_82], %506 {strides = array<i32>} : memref<2x1x128xf32, #tpu.memory_space<vmem>>, vector<1x1x128xf32>,
    return
  }
  func.func @transform_0(%arg0: i32) -> (i32, i32, i32) {
    %c0_i32 = arith.constant 0 : i32
    %c0_i32_0 = arith.constant 0 : i32
    %c0_i32_1 = arith.constant 0 : i32
    return %c0_i32, %arg0, %c0_i32_0 : i32, i32, i32
  }
  func.func @transform_1(%arg0: i32) -> i32 {
    %c0_i32 = arith.constant 0 : i32
    %c0_i32_0 = arith.constant 0 : i32
    return %c0_i32 : i32
  }
  func.func @transform_2(%arg0: i32) -> i32 {
    %c0_i32 = arith.constant 0 : i32
    %c0_i32_0 = arith.constant 0 : i32
    return %c0_i32 : i32
  }
  func.func @transform_3(%arg0: i32) -> i32 {
    %c0_i32 = arith.constant 0 : i32
    %c0_i32_0 = arith.constant 0 : i32
    return %c0_i32 : i32
  }
  func.func @transform_4(%arg0: i32) -> i32 {
    %c0_i32 = arith.constant 0 : i32
    %c0_i32_0 = arith.constant 0 : i32
    return %c0_i32 : i32
  }
  func.func @transform_5(%arg0: i32) -> (i32, i32, i32) {
    %c0_i32 = arith.constant 0 : i32
    %c0_i32_0 = arith.constant 0 : i32
    %c0_i32_1 = arith.constant 0 : i32
    return %c0_i32, %arg0, %c0_i32_0 : i32, i32, i32
  }
}

</mosaic_0001>

<bundles_post_ra>
// kernel: tpu_custom_call.1
= control target key start
LH: loop header
LB: loop body
LE: loop exit
PB: predicated region body
PF: predicated region fallthrough
CT: control target
= control target key end

     0   :  { %11 = vsyncpa [#allocation4], 0  ;;  %s1290_s0 = inlined_call_operand.hbm [shape: f32[4,1,128], index: 0, kind: input, shape index: {}]   ;;  %s1291_s1 = inlined_call_operand.vmem [shape: f32[80], index: 1, kind: input, shape index: {}]   ;;  %s1292_s2 = inlined_call_operand.vmem [shape: f32[20], index: 2, kind: input, shape index: {}]   ;;  %s1293_s3 = inlined_call_operand.vmem [shape: f32[20], index: 3, kind: input, shape index: {}]   ;;  %s1294_s4 = inlined_call_operand.<no memory space> [shape: f32[1], index: 4, kind: input, shape index: {}]   ;;  %s1295_s5 = inlined_call_operand.hbm [shape: f32[2,1,128], index: 5, kind: output, shape index: {}]  }
   0x1   :  { %12 = vsyncpa [#allocation6], 0 }
   0x2   :  { %13 = vsyncpa [#allocation9], 0  ;;  %s43_s20 = sshll.u32 %s1292_s2, 4  ;;  %s44_s20 = int_to_ptr.vmem [resolvable:$true] %s43_s20 }
   0x3   :  { %14 = vsyncpa [#allocation5], 0  ;;  %s699_s21 = scalar_lea.vmem %s44_s20, 16  ;;  %p704_p1 = scmp.lt.s32.totalorder %s44_s20, %s44_s20 }
   0x4   :  { %p700_p0 = scmp.ne.s32.totalorder %s44_s20, %s699_s21  ;;  %p705_p2 = scmp.lt.s32.totalorder %s699_s21, %s699_s21 }
   0x6   :  { %p706_p3 = por %p705_p2, %p704_p1 }
   0x8   :  { %p707_p4 = pnand %p706_p3, %p700_p0 }
   0xa   :  { %710 = shalt.err (!%p707_p4)
}
   0xb   :  { %s787_s22 = smov [#allocation8]   ;;  %s788_s23 = smov [#allocation3]  }
   0xc   :  { %46 = dma.vmem_to_smem %s44_s20, 16, %s787_s22, [#allocation9]  }
   0xd   :  { %s20_s24 = sshll.u32 %s788_s23, 4  ;;  %s711_s27 = scalar_lea.hbm %s1290_s0, 64  ;;  %s21_s24 = int_to_ptr.vmem [resolvable:$true] %s20_s24 }
   0xe   :  { %p712_p5 = scmp.ne.s32.totalorder %s1290_s0, %s711_s27  ;;  %p715_p6 = scmp.lt.u32.totalorder %s711_s27, %s1290_s0 }
  0x10   :  { %p717_p7 = pnand %p715_p6, %p712_p5 }
  0x12   :  { %720 = shalt.err (!%p717_p7)
}
  0x13   :  { %s721_s6 = scalar_lea.vmem %s21_s24, 64  ;;  %p726_p9 = scmp.lt.s32.totalorder %s21_s24, %s21_s24 }
  0x14   :  { %p722_p8 = scmp.ne.s32.totalorder %s21_s24, %s721_s6  ;;  %p727_p10 = scmp.lt.s32.totalorder %s721_s6, %s721_s6 }
  0x16   :  { %p728_p11 = por %p727_p10, %p726_p9 }
  0x18   :  { %p729_p12 = pnand %p728_p11, %p722_p8 }
  0x1a   :  { %732 = shalt.err (!%p729_p12)
}
  0x1b   :  { %s789_s7 = smov 16   ;;  %s790_s8 = smov 1  }
  0x1c   :  { %26 = dma.hbm_to_vmem [thread:$0]  %s1290_s0, 64, %s21_s24, [#allocation4], %s789_s7, %s789_s7, %s790_s8  }
  0x1d   :  { %s33_s13 = sshll.u32 %s1291_s1, 4  ;;  %s53_s16 = sshll.u32 %s1293_s3, 4  ;;  %s34_s13 = int_to_ptr.vmem [resolvable:$true] %s33_s13  ;;  %s54_s16 = int_to_ptr.vmem [resolvable:$true] %s53_s16 }
  0x1e   :  { %s733_s17 = scalar_lea.vmem %s34_s13, 16  ;;  %p738_p0 = scmp.lt.s32.totalorder %s34_s13, %s34_s13 }
  0x1f   :  { %p734_p13 = scmp.ne.s32.totalorder %s34_s13, %s733_s17  ;;  %p739_p1 = scmp.lt.s32.totalorder %s733_s17, %s733_s17 }
  0x21   :  { %p740_p2 = por %p739_p1, %p738_p0 }
  0x23   :  { %p741_p3 = pnand %p740_p2, %p734_p13 }
  0x25   :  { %744 = shalt.err (!%p741_p3)
}
  0x26   :  { %s791_s18 = smov [#allocation7]   ;;  %s745_s0 = scalar_lea.vmem %s54_s16, 16 }
  0x27   :  { %36 = dma.vmem_to_smem %s34_s13, 16, %s791_s18, [#allocation6]  }
  0x28   :  { %p746_p4 = scmp.ne.s32.totalorder %s54_s16, %s745_s0  ;;  %p750_p5 = scmp.lt.s32.totalorder %s54_s16, %s54_s16 }
  0x29   :  { %p751_p6 = scmp.lt.s32.totalorder %s745_s0, %s745_s0 }
  0x2b   :  { %p752_p7 = por %p751_p6, %p750_p5 }
  0x2d   :  { %p753_p8 = pnand %p752_p7, %p746_p4 }
  0x2f   :  { %756 = shalt.err (!%p753_p8)
}
  0x30   :  { %s792_s1 = smov [#allocation10]  }
  0x31   :  { %56 = dma.vmem_to_smem %s54_s16, 16, %s792_s1, [#allocation9]  }
  0x32   :  { %779 = dma.done.wait [#allocation4], 64  }
  0x33   :  { %780 = vsyncadd [#allocation4], 4294967232 }
  0x34   :  { %781 = dma.done.wait [#allocation6], 16  }
  0x35   :  { %782 = vsyncadd [#allocation6], 4294967280 }
  0x36   :  { %783 = dma.done.wait [#allocation9], 32  }
  0x37   :  { %784 = vsyncadd [#allocation9], 4294967264 }
  0x38   :  { %71 = sfence }
  0x39   :  { %s79_s3 = sld [smem:[#allocation7]]  ;;  %s571_s19 = sld [smem:[#allocation7 + $0x1]]  ;;  %v848_v0 = vld [vmem:[#allocation3] sm:$0x1]  ;;  %v854_v1 = vld [vmem:[#allocation3 + $0x1] sm:$0x1] }
  0x3a   :  { %s572_s20 = sld [smem:[#allocation7 + $0x2]]  ;;  %s573_s21 = sld [smem:[#allocation7 + $0x3]]  ;;  %v856_v2 = vld [vmem:[#allocation3 + $0x2] sm:$0x1]  ;;  %v862_v3 = vld [vmem:[#allocation3 + $0x3] sm:$0x1] }
  0x3b   :  { %s850_s22 = sld [smem:[#allocation8]]  ;;  %s574_s24 = sld [smem:[#allocation7 + $0x4]] }
  0x3c   :  { %s852_s23 = sld [smem:[#allocation10]]  ;;  %s575_s25 = sld [smem:[#allocation7 + $0x5]] }
  0x3d   :  { %s858_s26 = sld [smem:[#allocation7 + $0x6]]  ;;  %s860_s27 = sld [smem:[#allocation7 + $0x7]] }
  0x3e   :  { %s864_s28 = sld [smem:[#allocation8 + $0x1]]  ;;  %s868_s29 = sld [smem:[#allocation7 + $0x8]] }
  0x3f   :  { %s866_s2 = sld [smem:[#allocation10 + $0x1]]  ;;  %v80_v4 = vstv %s79_s3  ;;  %v83_v5 = vstv %s571_s19  ;;  %s874_s6 = sld [smem:[#allocation7 + $0xa]] }
  0x40   :  { %s870_s30 = sld [smem:[#allocation7 + $0x9]]  ;;  %v81_v6 = vmul.f32 %v80_v4, %v848_v0  ;;  %v84_v7 = vmul.f32 %v83_v5, %v854_v1  ;;  %v87_v8 = vstv %s572_s20  ;;  %v91_v9 = vstv %s573_s21  ;;  %s876_s9 = sld [smem:[#allocation7 + $0xb]] }
  0x41   :  { %v88_v10 = vmul.f32 %v87_v8, %v856_v2  ;;  %v92_v11 = vmul.f32 %v91_v9, %v862_v3  ;;  %s880_s10 = sld [smem:[#allocation8 + $0x2]]  ;;  %v95_v13 = vstv %s850_s22  ;;  %v103_v14 = vstv %s574_s24  ;;  %s885_s12 = sld [smem:[#allocation7 + $0xc]] }
  0x42   :  { %s882_s11 = sld [smem:[#allocation10 + $0x2]]  ;;  %v85_v12 = vadd.f32 %v84_v7, %v81_v6  ;;  %v106_v15 = vstv %s575_s25  ;;  %s887_s13 = sld [smem:[#allocation7 + $0xd]]  ;;  %v104_v16 = vmul.f32 %v103_v14, %v848_v0  ;;  %v99_v21 = vstv %s852_s23 }
  0x43   :  { %v107_v17 = vmul.f32 %v106_v15, %v854_v1  ;;  %v110_v18 = vstv %s858_s26  ;;  %v114_v19 = vstv %s860_s27  ;;  %s893_s14 = sld [smem:[#allocation7 + $0xe]]  ;;  %s895_s15 = sld [smem:[#allocation7 + $0xf]] }
  0x44   :  { %v89_v20 = vadd.f32 %v88_v10, %v85_v12  ;;  %v111_v22 = vmul.f32 %v110_v18, %v856_v2  ;;  %v115_v23 = vmul.f32 %v114_v19, %v862_v3  ;;  %s900_s16 = sld [smem:[#allocation8 + $0x3]]  ;;  %v118_v25 = vstv %s864_s28  ;;  %s905_s17 = sld [smem:[#allocation7 + $0x10]] }
  0x45   :  { %v108_v24 = vadd.f32 %v107_v17, %v104_v16  ;;  %v126_v26 = vstv %s868_s29  ;;  %s907_s18 = sld [smem:[#allocation7 + $0x11]]  ;;  %v133_v31 = vstv %s874_s6  ;;  %s912_s0 = sld [smem:[#allocation10 + $0x3]]  ;;  %v122_v33 = vstv %s866_s2 }
  0x46   :  { %v129_v27 = vstv %s870_s30  ;;  %v93_v28 = vadd.f32 %v92_v11, %v89_v20  ;;  %v127_v29 = vmul.f32 %v126_v26, %v848_v0  ;;  %v134_v34 = vmul.f32 %v133_v31, %v856_v2  ;;  %s917_s1 = sld [smem:[#allocation7 + $0x12]]  ;;  %s919_s3 = sld [smem:[#allocation7 + $0x13]] }
  0x47   :  { %v130_v30 = vmul.f32 %v129_v27, %v854_v1  ;;  %v112_v32 = vadd.f32 %v111_v22, %v108_v24  ;;  %v137_v35 = vstv %s876_s9  ;;  %v141_v39 = vstv %s880_s10  ;;  %s926_s19 = sld [smem:[#allocation8 + $0x4]]  ;;  %s934_s22 = sld [smem:[#allocation7 + $0x15]] }
  0x48   :  { %v96_v36 = vadd.f32 %v95_v13, %v93_v28  ;;  %v138_v38 = vmul.f32 %v137_v35, %v862_v3  ;;  %v149_v41 = vstv %s885_s12  ;;  %v152_v42 = vstv %s887_s13  ;;  %s928_s20 = sld [smem:[#allocation7 + $0x14]]  ;;  %s939_s23 = sld [smem:[#allocation7 + $0x16]] }
  0x49   :  { %v131_v37 = vadd.f32 %v130_v30, %v127_v29  ;;  %v116_v40 = vadd.f32 %v115_v23, %v112_v32  ;;  %v156_v43 = vstv %s893_s14  ;;  %v150_v46 = vmul.f32 %v149_v41, %v848_v0  ;;  %s932_s21 = sld [smem:[#allocation10 + $0x4]]  ;;  %s941_s24 = sld [smem:[#allocation7 + $0x17]] }
  0x4a   :  { %v97_v44 = vmax.f32 %v96_v36, 0.0  ;;  %v153_v47 = vmul.f32 %v152_v42, %v854_v1  ;;  %v145_v49 = vstv %s882_s11  ;;  %v157_v50 = vmul.f32 %v156_v43, %v856_v2  ;;  %s945_s25 = sld [smem:[#allocation8 + $0x5]]  ;;  %s949_s26 = sld [smem:[#allocation7 + $0x18]] }
  0x4b   :  { %v135_v45 = vadd.f32 %v134_v34, %v131_v37  ;;  %v119_v48 = vadd.f32 %v118_v25, %v116_v40  ;;  %v160_v51 = vstv %s895_s15  ;;  %v164_v55 = vstv %s900_s16  ;;  %s953_s27 = sld [smem:[#allocation10 + $0x5]]  ;;  %s955_s28 = sld [smem:[#allocation7 + $0x19]] }
  0x4c   :  { %v154_v53 = vadd.f32 %v153_v47, %v150_v46  ;;  %v161_v54 = vmul.f32 %v160_v51, %v862_v3  ;;  %v100_v56 = vmul.f32 %v99_v21, %v97_v44  ;;  %v172_v58 = vstv %s905_s17  ;;  %s960_s2 = sld [smem:[#allocation7 + $0x1a]]  ;;  %s962_s29 = sld [smem:[#allocation7 + $0x1b]] }
  0x4d   :  { %v139_v52 = vadd.f32 %v138_v38, %v135_v45  ;;  %v120_v57 = vmax.f32 %v119_v48, 0.0  ;;  %v175_v59 = vstv %s907_s18  ;;  %v173_v62 = vmul.f32 %v172_v58, %v848_v0  ;;  %s965_s30 = sld [smem:[#allocation8 + $0x6]]  ;;  %s970_s6 = sld [smem:[#allocation7 + $0x1c]] }
  0x4e   :  { %v158_v61 = vadd.f32 %v157_v50, %v154_v53  ;;  %v176_v63 = vmul.f32 %v175_v59, %v854_v1  ;;  %v168_v5 = vstv %s912_s0  ;;  %v179_v6 = vstv %s917_s1  ;;  %s973_s9 = sld [smem:[#allocation10 + $0x6]]  ;;  %s975_s10 = sld [smem:[#allocation7 + $0x1d]] }
  0x4f   :  { %v142_v60 = vadd.f32 %v141_v39, %v139_v52  ;;  %v123_v4 = vmul.f32 %v122_v33, %v120_v57  ;;  %v183_v7 = vstv %s919_s3  ;;  %v180_v11 = vmul.f32 %v179_v6, %v856_v2  ;;  %s981_s11 = sld [smem:[#allocation7 + $0x1e]]  ;;  %s983_s12 = sld [smem:[#allocation7 + $0x1f]] }
  0x50   :  { %v162_v9 = vadd.f32 %v161_v54, %v158_v61  ;;  %v177_v10 = vadd.f32 %v176_v63, %v173_v62  ;;  %v184_v13 = vmul.f32 %v183_v7, %v862_v3  ;;  %v187_v14 = vstv %s926_s19  ;;  %s987_s13 = sld [smem:[#allocation8 + $0x7]]  ;;  %s992_s14 = sld [smem:[#allocation7 + $0x20]] }
  0x51   :  { %v143_v8 = vmax.f32 %v142_v60, 0.0  ;;  %v124_v12 = vadd.f32 %v123_v4, %v100_v56  ;;  %v195_v15 = vstv %s928_s20  ;;  %v191_v20 = vstv %s932_s21  ;;  %s995_s15 = sld [smem:[#allocation10 + $0x7]]  ;;  %s997_s16 = sld [smem:[#allocation7 + $0x21]] }
  0x52   :  { %v165_v17 = vadd.f32 %v164_v55, %v162_v9  ;;  %v181_v18 = vadd.f32 %v180_v11, %v177_v10  ;;  %v196_v19 = vmul.f32 %v195_v15, %v848_v0  ;;  %v198_v21 = vstv %s934_s22  ;;  %s1003_s17 = sld [smem:[#allocation7 + $0x22]]  ;;  %s1005_s18 = sld [smem:[#allocation7 + $0x23]] }
  0x53   :  { %v146_v16 = vmul.f32 %v145_v49, %v143_v8  ;;  %v202_v22 = vstv %s939_s23  ;;  %v206_v23 = vstv %s941_s24  ;;  %v199_v26 = vmul.f32 %v198_v21, %v854_v1  ;;  %s1012_s0 = sld [smem:[#allocation8 + $0x8]]  ;;  %s1014_s1 = sld [smem:[#allocation7 + $0x24]] }
  0x54   :  { %v166_v24 = vmax.f32 %v165_v17, 0.0  ;;  %v185_v25 = vadd.f32 %v184_v13, %v181_v18  ;;  %v210_v27 = vstv %s945_s25  ;;  %v203_v29 = vmul.f32 %v202_v22, %v856_v2  ;;  %s1017_s3 = sld [smem:[#allocation7 + $0x25]]  ;;  %s1023_s19 = sld [smem:[#allocation7 + $0x26]] }
  0x55   :  { %v147_v28 = vadd.f32 %v146_v16, %v124_v12  ;;  %v207_v30 = vmul.f32 %v206_v23, %v862_v3  ;;  %v218_v31 = vstv %s949_s26  ;;  %v200_v34 = vadd.f32 %v199_v26, %v196_v19  ;;  %s1025_s20 = sld [smem:[#allocation7 + $0x27]]  ;;  %s1032_s21 = sld [smem:[#allocation10 + $0x8]] }
  0x56   :  { %v169_v32 = vmul.f32 %v168_v5, %v166_v24  ;;  %v188_v33 = vadd.f32 %v187_v14, %v185_v25  ;;  %v219_v35 = vmul.f32 %v218_v31, %v848_v0  ;;  %v214_v36 = vstv %s953_s27  ;;  %s1034_s22 = sld [smem:[#allocation8 + $0x9]]  ;;  %s1037_s23 = sld [smem:[#allocation7 + $0x28]] }
  0x57   :  { %v221_v37 = vstv %s955_s28  ;;  %v225_v38 = vstv %s960_s2  ;;  %v229_v39 = vstv %s962_s29  ;;  %v204_v41 = vadd.f32 %v203_v29, %v200_v34  ;;  %s1039_s24 = sld [smem:[#allocation7 + $0x29]]  ;;  %s1045_s25 = sld [smem:[#allocation7 + $0x2a]] }
  0x58   :  { %v189_v40 = vmax.f32 %v188_v33, 0.0  ;;  %v222_v42 = vmul.f32 %v221_v37, %v854_v1  ;;  %v233_v43 = vstv %s965_s30  ;;  %v170_v44 = vadd.f32 %v169_v32, %v147_v28  ;;  %s1047_s26 = sld [smem:[#allocation7 + $0x2b]]  ;;  %s1054_s27 = sld [smem:[#allocation10 + $0x9]] }
  0x59   :  { %v226_v45 = vmul.f32 %v225_v38, %v856_v2  ;;  %v230_v46 = vmul.f32 %v229_v39, %v862_v3  ;;  %v241_v47 = vstv %s970_s6  ;;  %v208_v49 = vadd.f32 %v207_v30, %v204_v41  ;;  %s1056_s28 = sld [smem:[#allocation8 + $0xa]]  ;;  %s1058_s2 = sld [smem:[#allocation7 + $0x2c]] }
  0x5a   :  { %v192_v48 = vmul.f32 %v191_v20, %v189_v40  ;;  %v223_v50 = vadd.f32 %v222_v42, %v219_v35  ;;  %v242_v51 = vmul.f32 %v241_v47, %v848_v0  ;;  %v237_v52 = vstv %s973_s9  ;;  %s1064_s29 = sld [smem:[#allocation7 + $0x2d]]  ;;  %s1066_s30 = sld [smem:[#allocation7 + $0x2e]] }
  0x5b   :  { %v244_v53 = vstv %s975_s10  ;;  %v248_v54 = vstv %s981_s11  ;;  %v252_v55 = vstv %s983_s12  ;;  %v211_v56 = vadd.f32 %v210_v27, %v208_v49  ;;  %s1073_s6 = sld [smem:[#allocation10 + $0xa]]  ;;  %s1075_s9 = sld [smem:[#allocation7 + $0x2f]] }
  0x5c   :  { %v227_v57 = vadd.f32 %v226_v45, %v223_v50  ;;  %v245_v58 = vmul.f32 %v244_v53, %v854_v1  ;;  %v256_v59 = vstv %s987_s13  ;;  %v193_v60 = vadd.f32 %v192_v48, %v170_v44  ;;  %s1077_s10 = sld [smem:[#allocation8 + $0xb]]  ;;  %s1083_s11 = sld [smem:[#allocation7 + $0x30]] }
  0x5d   :  { %v249_v61 = vmul.f32 %v248_v54, %v856_v2  ;;  %v253_v62 = vmul.f32 %v252_v55, %v862_v3  ;;  %v264_v63 = vstv %s992_s14  ;;  %v212_v4 = vmax.f32 %v211_v56, 0.0  ;;  %s1085_s12 = sld [smem:[#allocation7 + $0x31]]  ;;  %s1088_s13 = sld [smem:[#allocation10 + $0xb]] }
  0x5e   :  { %v231_v5 = vadd.f32 %v230_v46, %v227_v57  ;;  %v246_v6 = vadd.f32 %v245_v58, %v242_v51  ;;  %v265_v7 = vmul.f32 %v264_v63, %v848_v0  ;;  %v260_v8 = vstv %s995_s15  ;;  %s1094_s14 = sld [smem:[#allocation7 + $0x32]]  ;;  %s1096_s15 = sld [smem:[#allocation7 + $0x33]] }
  0x5f   :  { %v267_v9 = vstv %s997_s16  ;;  %v271_v10 = vstv %s1003_s17  ;;  %v275_v11 = vstv %s1005_s18  ;;  %v215_v12 = vmul.f32 %v214_v36, %v212_v4  ;;  %s1099_s16 = sld [smem:[#allocation8 + $0xc]]  ;;  %s1108_s18 = sld [smem:[#allocation7 + $0x35]] }
  0x60   :  { %v234_v13 = vadd.f32 %v233_v43, %v231_v5  ;;  %v250_v14 = vadd.f32 %v249_v61, %v246_v6  ;;  %v268_v15 = vmul.f32 %v267_v9, %v854_v1  ;;  %v272_v16 = vmul.f32 %v271_v10, %v856_v2  ;;  %s1104_s17 = sld [smem:[#allocation7 + $0x34]] }
  0x61   :  { %v276_v17 = vmul.f32 %v275_v11, %v862_v3  ;;  %v279_v18 = vstv %s1012_s0  ;;  %v287_v19 = vstv %s1014_s1  ;;  %v216_v20 = vadd.f32 %v215_v12, %v193_v60  ;;  %s1113_s0 = sld [smem:[#allocation7 + $0x36]]  ;;  %s1115_s1 = sld [smem:[#allocation7 + $0x37]] }
  0x62   :  { %v235_v21 = vmax.f32 %v234_v13, 0.0  ;;  %v254_v22 = vadd.f32 %v253_v62, %v250_v14  ;;  %v269_v23 = vadd.f32 %v268_v15, %v265_v7  ;;  %v288_v24 = vmul.f32 %v287_v19, %v848_v0 }
  0x63   :  { %v290_v25 = vstv %s1017_s3  ;;  %v294_v26 = vstv %s1023_s19  ;;  %v298_v27 = vstv %s1025_s20  ;;  %v283_v32 = vstv %s1032_s21  ;;  %s1121_s3 = sld [smem:[#allocation10 + $0xc]]  ;;  %s1125_s19 = sld [smem:[#allocation7 + $0x38]] }
  0x64   :  { %v238_v28 = vmul.f32 %v237_v52, %v235_v21  ;;  %v257_v29 = vadd.f32 %v256_v59, %v254_v22  ;;  %v273_v30 = vadd.f32 %v272_v16, %v269_v23  ;;  %v291_v31 = vmul.f32 %v290_v25, %v854_v1  ;;  %s1127_s20 = sld [smem:[#allocation7 + $0x39]]  ;;  %s1132_s21 = sld [smem:[#allocation7 + $0x3a]] }
  0x65   :  { %v295_v33 = vmul.f32 %v294_v26, %v856_v2  ;;  %v299_v34 = vmul.f32 %v298_v27, %v862_v3  ;;  %v302_v35 = vstv %s1034_s22  ;;  %v310_v40 = vstv %s1037_s23  ;;  %s1136_s22 = sld [smem:[#allocation8 + $0xd]]  ;;  %s1138_s23 = sld [smem:[#allocation7 + $0x3b]] }
  0x66   :  { %v239_v36 = vadd.f32 %v238_v28, %v216_v20  ;;  %v258_v37 = vmax.f32 %v257_v29, 0.0  ;;  %v277_v38 = vadd.f32 %v276_v17, %v273_v30  ;;  %v292_v39 = vadd.f32 %v291_v31, %v288_v24 }
  0x67   :  { %v313_v41 = vstv %s1039_s24  ;;  %v317_v42 = vstv %s1045_s25  ;;  %v321_v43 = vstv %s1047_s26  ;;  %v311_v47 = vmul.f32 %v310_v40, %v848_v0  ;;  %s1142_s24 = sld [smem:[#allocation10 + $0xd]]  ;;  %s1146_s25 = sld [smem:[#allocation7 + $0x3c]] }
  0x68   :  { %v261_v44 = vmul.f32 %v260_v8, %v258_v37  ;;  %v280_v45 = vadd.f32 %v279_v18, %v277_v38  ;;  %v296_v46 = vadd.f32 %v295_v33, %v292_v39  ;;  %v306_v48 = vstv %s1054_s27  ;;  %s1148_s26 = sld [smem:[#allocation7 + $0x3d]]  ;;  %s1153_s27 = sld [smem:[#allocation8 + $0xe]] }
  0x69   :  { %v314_v49 = vmul.f32 %v313_v41, %v854_v1  ;;  %v318_v50 = vmul.f32 %v317_v42, %v856_v2  ;;  %v322_v51 = vmul.f32 %v321_v43, %v862_v3  ;;  %v325_v55 = vstv %s1056_s28  ;;  %s1155_s28 = sld [smem:[#allocation10 + $0xe]] }
  0x6a   :  { %v262_v52 = vadd.f32 %v261_v44, %v239_v36  ;;  %v281_v53 = vmax.f32 %v280_v45, 0.0  ;;  %v300_v54 = vadd.f32 %v299_v34, %v296_v46  ;;  %v333_v57 = vstv %s1058_s2  ;;  %s1158_s2 = sld [smem:[#allocation7 + $0x3e]] }
  0x6b   :  { %v315_v56 = vadd.f32 %v314_v49, %v311_v47  ;;  %v336_v58 = vstv %s1064_s29  ;;  %v340_v59 = vstv %s1066_s30  ;;  %v334_v62 = vmul.f32 %v333_v57, %v848_v0  ;;  %s1160_s29 = sld [smem:[#allocation7 + $0x3f]]  ;;  %s1166_s30 = sld [smem:[#allocation7 + $0x40]] }
  0x6c   :  { %v284_v60 = vmul.f32 %v283_v32, %v281_v53  ;;  %v303_v61 = vadd.f32 %v302_v35, %v300_v54  ;;  %v337_v63 = vmul.f32 %v336_v58, %v854_v1  ;;  %v329_v5 = vstv %s1073_s6  ;;  %s1168_s6 = sld [smem:[#allocation7 + $0x41]] }
  0x6d   :  { %v319_v4 = vadd.f32 %v318_v50, %v315_v56  ;;  %v341_v6 = vmul.f32 %v340_v59, %v856_v2  ;;  %v344_v7 = vstv %s1075_s9  ;;  %v348_v11 = vstv %s1077_s10  ;;  %s1173_s9 = sld [smem:[#allocation8 + $0xf]]  ;;  %s1178_s10 = sld [smem:[#allocation7 + $0x42]] }
  0x6e   :  { %v304_v8 = vmax.f32 %v303_v61, 0.0  ;;  %v338_v9 = vadd.f32 %v337_v63, %v334_v62  ;;  %v345_v10 = vmul.f32 %v344_v7, %v862_v3  ;;  %v285_v12 = vadd.f32 %v284_v60, %v262_v52 }
  0x6f   :  { %v323_v13 = vadd.f32 %v322_v51, %v319_v4  ;;  %v356_v14 = vstv %s1083_s11  ;;  %v359_v15 = vstv %s1085_s12  ;;  %v352_v21 = vstv %s1088_s13  ;;  %s1180_s11 = sld [smem:[#allocation7 + $0x43]]  ;;  %s1184_s12 = sld [smem:[#allocation10 + $0xf]] }
  0x70   :  { %v307_v16 = vmul.f32 %v306_v48, %v304_v8  ;;  %v342_v17 = vadd.f32 %v341_v6, %v338_v9  ;;  %v357_v18 = vmul.f32 %v356_v14, %v848_v0  ;;  %v360_v19 = vmul.f32 %v359_v15, %v854_v1  ;;  %s1188_s13 = sld [smem:[#allocation7 + $0x44]] }
  0x71   :  { %v326_v20 = vadd.f32 %v325_v55, %v323_v13  ;;  %v363_v22 = vstv %s1094_s14  ;;  %v367_v23 = vstv %s1096_s15  ;;  %v371_v27 = vstv %s1099_s16  ;;  %s1192_s14 = sld [smem:[#allocation7 + $0x45]]  ;;  %s1198_s15 = sld [smem:[#allocation7 + $0x46]] }
  0x72   :  { %v346_v24 = vadd.f32 %v345_v10, %v342_v17  ;;  %v361_v25 = vadd.f32 %v360_v19, %v357_v18  ;;  %v364_v26 = vmul.f32 %v363_v22, %v856_v2  ;;  %v308_v28 = vadd.f32 %v307_v16, %v285_v12  ;;  %s1200_s16 = sld [smem:[#allocation7 + $0x47]] }
  0x73   :  { %v327_v29 = vmax.f32 %v326_v20, 0.0  ;;  %v368_v30 = vmul.f32 %v367_v23, %v862_v3  ;;  %v379_v31 = vstv %s1104_s17  ;;  %v382_v35 = vstv %s1108_s18  ;;  %s1203_s17 = sld [smem:[#allocation8 + $0x10]] }
  0x74   :  { %v349_v32 = vadd.f32 %v348_v11, %v346_v24  ;;  %v365_v33 = vadd.f32 %v364_v26, %v361_v25  ;;  %v380_v34 = vmul.f32 %v379_v31, %v848_v0  ;;  %v383_v37 = vmul.f32 %v382_v35, %v854_v1  ;;  %s1205_s18 = sld [smem:[#allocation10 + $0x10]] }
  0x75   :  { %v330_v36 = vmul.f32 %v329_v5, %v327_v29  ;;  %v386_v38 = vstv %s1113_s0  ;;  %v390_v39 = vstv %s1115_s1  ;;  %v375_v44 = vstv %s1121_s3  ;;  %s1210_s0 = sld [smem:[#allocation7 + $0x48]]  ;;  %s1213_s1 = sld [smem:[#allocation7 + $0x49]] }
  0x76   :  { %v350_v40 = vmax.f32 %v349_v32, 0.0  ;;  %v369_v41 = vadd.f32 %v368_v30, %v365_v33  ;;  %v387_v42 = vmul.f32 %v386_v38, %v856_v2  ;;  %v384_v45 = vadd.f32 %v383_v37, %v380_v34  ;;  %s1215_s3 = sld [smem:[#allocation7 + $0x4a]] }
  0x77   :  { %v331_v43 = vadd.f32 %v330_v36, %v308_v28  ;;  %v391_v46 = vmul.f32 %v390_v39, %v862_v3  ;;  %v402_v49 = vstv %s1125_s19  ;;  %v405_v50 = vstv %s1127_s20  ;;  %s1221_s19 = sld [smem:[#allocation8 + $0x11]] }
  0x78   :  { %v353_v47 = vmul.f32 %v352_v21, %v350_v40  ;;  %v372_v48 = vadd.f32 %v371_v27, %v369_v41  ;;  %v388_v51 = vadd.f32 %v387_v42, %v384_v45  ;;  %v403_v52 = vmul.f32 %v402_v49, %v848_v0  ;;  %s1225_s20 = sld [smem:[#allocation10 + $0x11]] }
  0x79   :  { %v406_v53 = vmul.f32 %v405_v50, %v854_v1  ;;  %v409_v54 = vstv %s1132_s21  ;;  %v394_v56 = vstv %s1136_s22  ;;  %v413_v58 = vstv %s1138_s23  ;;  %s1227_s21 = sld [smem:[#allocation7 + $0x4b]]  ;;  %s1231_s22 = sld [smem:[#allocation7 + $0x4c]] }
  0x7a   :  { %v373_v55 = vmax.f32 %v372_v48, 0.0  ;;  %v410_v57 = vmul.f32 %v409_v54, %v856_v2  ;;  %v392_v59 = vadd.f32 %v391_v46, %v388_v51  ;;  %v398_v60 = vstv %s1142_s24  ;;  %s1235_s23 = sld [smem:[#allocation7 + $0x4d]]  ;;  %s1237_s24 = sld [smem:[#allocation7 + $0x4e]] }
  0x7b   :  { %v407_v61 = vadd.f32 %v406_v53, %v403_v52  ;;  %v414_v62 = vmul.f32 %v413_v58, %v862_v3  ;;  %v354_v63 = vadd.f32 %v353_v47, %v331_v43  ;;  %v425_v5 = vstv %s1146_s25  ;;  %s1245_s25 = sld [smem:[#allocation8 + $0x12]] }
  0x7c   :  { %v376_v4 = vmul.f32 %v375_v44, %v373_v55  ;;  %v428_v6 = vstv %s1148_s26  ;;  %v395_v7 = vadd.f32 %v394_v56, %v392_v59  ;;  %v426_v9 = vmul.f32 %v425_v5, %v848_v0  ;;  %s1247_s26 = sld [smem:[#allocation7 + $0x4f]] }
  0x7d   :  { %v411_v8 = vadd.f32 %v410_v57, %v407_v61  ;;  %v429_v10 = vmul.f32 %v428_v6, %v854_v1  ;;  %v417_v11 = vstv %s1153_s27  ;;  %v421_v12 = vstv %s1155_s28  ;;  %s1259_s27 = sld [smem:[#allocation10 + $0x12]]  ;;  %s686_s28 = sld [smem:[#allocation8 + $0x13]] }
  0x7e   :  { %v432_v13 = vstv %s1158_s2  ;;  %v436_v14 = vstv %s1160_s29  ;;  %v396_v15 = vmax.f32 %v395_v7, 0.0  ;;  %v377_v19 = vadd.f32 %v376_v4, %v354_v63  ;;  %s687_s2 = sld [smem:[#allocation10 + $0x13]] }
  0x7f   :  { %v415_v16 = vadd.f32 %v414_v62, %v411_v8  ;;  %v430_v17 = vadd.f32 %v429_v10, %v426_v9  ;;  %v433_v18 = vmul.f32 %v432_v13, %v856_v2  ;;  %v437_v20 = vmul.f32 %v436_v14, %v862_v3 }
  0x80   :  { %v448_v21 = vstv %s1166_s30  ;;  %v451_v22 = vstv %s1168_s6  ;;  %v399_v23 = vmul.f32 %v398_v60, %v396_v15  ;;  %v440_v27 = vstv %s1173_s9  ;;  %s793_s6 = smov [#allocation11]  }
  0x81   :  { %v418_v24 = vadd.f32 %v417_v11, %v415_v16  ;;  %v434_v25 = vadd.f32 %v433_v18, %v430_v17  ;;  %v449_v26 = vmul.f32 %v448_v21, %v848_v0  ;;  %v452_v28 = vmul.f32 %v451_v22, %v854_v1  ;;  %s557_s9 = sshll.u32 %s793_s6, 4  ;;  %s558_s9 = int_to_ptr.vmem [resolvable:$true] %s557_s9 }
  0x82   :  { %v455_v29 = vstv %s1178_s10  ;;  %v459_v30 = vstv %s1180_s11  ;;  %v444_v33 = vstv %s1184_s12  ;;  %v400_v35 = vadd.f32 %v399_v23, %v377_v19  ;;  %s757_s10 = scalar_lea.vmem %s558_s9, 32  ;;  %p762_p10 = scmp.lt.s32.totalorder %s558_s9, %s558_s9 }
  0x83   :  { %v419_v31 = vmax.f32 %v418_v24, 0.0  ;;  %v438_v32 = vadd.f32 %v437_v20, %v434_v25  ;;  %v456_v34 = vmul.f32 %v455_v29, %v856_v2  ;;  %v453_v36 = vadd.f32 %v452_v28, %v449_v26  ;;  %p758_p9 = scmp.ne.s32.totalorder %s558_s9, %s757_s10  ;;  %p763_p11 = scmp.lt.s32.totalorder %s757_s10, %s757_s10 }
  0x84   :  { %v460_v37 = vmul.f32 %v459_v30, %v862_v3  ;;  %v471_v38 = vstv %s1188_s13  ;;  %v474_v42 = vstv %s1192_s14  ;;  %v478_v45 = vstv %s1198_s15 }
  0x85   :  { %v422_v39 = vmul.f32 %v421_v12, %v419_v31  ;;  %v441_v40 = vadd.f32 %v440_v27, %v438_v32  ;;  %v472_v41 = vmul.f32 %v471_v38, %v848_v0  ;;  %v457_v43 = vadd.f32 %v456_v34, %v453_v36  ;;  %p764_p12 = por %p763_p11, %p762_p10 }
  0x86   :  { %v475_v44 = vmul.f32 %v474_v42, %v854_v1  ;;  %v482_v46 = vstv %s1200_s16  ;;  %v463_v48 = vstv %s1203_s17  ;;  %v467_v49 = vstv %s1205_s18 }
  0x87   :  { %v442_v47 = vmax.f32 %v441_v40, 0.0  ;;  %v479_v50 = vmul.f32 %v478_v45, %v856_v2  ;;  %v423_v51 = vadd.f32 %v422_v39, %v400_v35  ;;  %v461_v52 = vadd.f32 %v460_v37, %v457_v43  ;;  %p765_p13 = pnand %p764_p12, %p758_p9 }
  0x88   :  { %v476_v53 = vadd.f32 %v475_v44, %v472_v41  ;;  %v483_v54 = vmul.f32 %v482_v46, %v862_v3  ;;  %v494_v56 = vstv %s1210_s0  ;;  %v497_v57 = vstv %s1213_s1 }
  0x89   :  { %v445_v55 = vmul.f32 %v444_v33, %v442_v47  ;;  %v501_v58 = vstv %s1215_s3  ;;  %v464_v59 = vadd.f32 %v463_v48, %v461_v52  ;;  %v495_v61 = vmul.f32 %v494_v56, %v848_v0 }
  0x8a   :  { %v480_v60 = vadd.f32 %v479_v50, %v476_v53  ;;  %v498_v62 = vmul.f32 %v497_v57, %v854_v1  ;;  %v486_v63 = vstv %s1221_s19  ;;  %v490_v4 = vstv %s1225_s20 }
  0x8b   :  { %v502_v5 = vmul.f32 %v501_v58, %v856_v2  ;;  %v505_v6 = vstv %s1227_s21  ;;  %v465_v7 = vmax.f32 %v464_v59, 0.0  ;;  %v446_v11 = vadd.f32 %v445_v55, %v423_v51 }
  0x8c   :  { %v484_v8 = vadd.f32 %v483_v54, %v480_v60  ;;  %v499_v9 = vadd.f32 %v498_v62, %v495_v61  ;;  %v506_v10 = vmul.f32 %v505_v6, %v862_v3  ;;  %v517_v12 = vstv %s1231_s22 }
  0x8d   :  { %v520_v13 = vstv %s1235_s23  ;;  %v524_v14 = vstv %s1237_s24  ;;  %v468_v15 = vmul.f32 %v467_v49, %v465_v7  ;;  %v518_v18 = vmul.f32 %v517_v12, %v848_v0 }
  0x8e   :  { %v487_v16 = vadd.f32 %v486_v63, %v484_v8  ;;  %v503_v17 = vadd.f32 %v502_v5, %v499_v9  ;;  %v509_v19 = vstv %s1245_s25  ;;  %v521_v20 = vmul.f32 %v520_v13, %v854_v1 }
  0x8f   :  { %v525_v21 = vmul.f32 %v524_v14, %v856_v2  ;;  %v528_v22 = vstv %s1247_s26  ;;  %v469_v25 = vadd.f32 %v468_v15, %v446_v11  ;;  %v513_v30 = vstv %s1259_s27 }
  0x90   :  { %v488_v23 = vmax.f32 %v487_v16, 0.0  ;;  %v507_v24 = vadd.f32 %v506_v10, %v503_v17  ;;  %v522_v26 = vadd.f32 %v521_v20, %v518_v18  ;;  %v529_v27 = vmul.f32 %v528_v22, %v862_v3 }
  0x91   :  { %v532_v33 = vstv %s686_s28  ;;  %v536_v36 = vstv %s687_s2  ;;  %v540_v39 = vstv %s1294_s4 }
  0x92   :  { %v491_v28 = vmul.f32 %v490_v4, %v488_v23  ;;  %v510_v29 = vadd.f32 %v509_v19, %v507_v24  ;;  %v526_v31 = vadd.f32 %v525_v21, %v522_v26 }
  0x94   :  { %v511_v32 = vmax.f32 %v510_v29, 0.0  ;;  %v492_v0 = vadd.f32 %v491_v28, %v469_v25  ;;  %v530_v34 = vadd.f32 %v529_v27, %v526_v31 }
  0x96   :  { %v514_v35 = vmul.f32 %v513_v30, %v511_v32  ;;  %v533_v1 = vadd.f32 %v532_v33, %v530_v34 }
  0x98   :  { %v515_v2 = vadd.f32 %v514_v35, %v492_v0  ;;  %v534_v37 = vmax.f32 %v533_v1, 0.0 }
  0x9a   :  { %v537_v38 = vmul.f32 %v536_v36, %v534_v37 }
  0x9c   :  { %v538_v40 = vadd.f32 %v537_v38, %v515_v2 }
  0x9e   :  { %v541_v3 = vadd.f32 %v540_v39, %v538_v40 }
  0xa0   :  { %v542_v41 = vsub.f32 0.0, %v541_v3 }
  0xa2   :  { %v543_v42 = vmul.f32 1.442695, %v542_v41 }
  0xa4   :  { %695 = vpow2.f32 %v543_v42 }
  0xae   :  { %v696_v43 = vpop.eup %695 }
  0xaf   :  { %v545_v44 = vadd.f32 1.0, %v696_v43 }
  0xb1   :  { %697 = vrcp.f32 %v545_v44 }
  0xbb   :  { %v698_v45 = vpop.eup %697 }
  0xbc   :  { %548 = vst [vmem:[#allocation11] sm:$0x1] %v698_v45  ;;  %v549_v46 = vsub.f32 1.0, %v698_v45 }
  0xbe   :  { %551 = vst [vmem:[#allocation11 + $0x1] sm:$0x1] %v549_v46 }
  0xbf   :  { %768 = shalt.err (!%p765_p13)
}
  0xc0   :  { %s769_s12 = scalar_lea.hbm %s1295_s5, 32 }
  0xc1   :  { %p770_p0 = scmp.ne.s32.totalorder %s1295_s5, %s769_s12  ;;  %p773_p1 = scmp.lt.u32.totalorder %s769_s12, %s1295_s5 }
  0xc3   :  { %p775_p2 = pnand %p773_p1, %p770_p0 }
  0xc5   :  { %778 = shalt.err (!%p775_p2)
}
  0xc6   :  { %563 = dma.vmem_to_hbm [thread:$0]  %s558_s9, 32, %s1295_s5, [#allocation5], %s789_s7, %s789_s7, %s790_s8  }
  0xc7   :  { %785 = dma.done.wait [#allocation5], 32  }
  0xc8   :  { %786 = vsyncadd [#allocation5], 4294967264 }
  0xc9   :  { %567 = vsyncpa [#allocation4], 1 }
  0xca   :  { %568 = vsyncpa [#allocation5], 1 }
  0xcb   :  { %569 = vsyncpa [#allocation6], 1 }
  0xcc   :  { %570 = vsyncpa [#allocation9], 1 }

</bundles_post_ra>
